<compile_context>
chip_gen: v5e
topology: v5e:2x2
jax: 0.10.0
libtpu: 0.0.40
codegen_flags: <defaults>
</compile_context>

<pallas_src>
import jax
import jax.numpy as jnp
import numpy as np
from jax.experimental import pallas as pl
from jax.experimental.pallas import tpu as pltpu

LANE = 128


# ---------------------------------------------------------------------------
# Bilinear interpolation helpers (PyTorch align_corners=False semantics),
# computed with NumPy at trace time (all static).
# ---------------------------------------------------------------------------
def _bilinear_coeffs(out_size, in_size):
    if out_size == in_size:
        idx = np.arange(out_size, dtype=np.int64)
        return idx, idx, np.ones(out_size), np.zeros(out_size)
    scale = in_size / out_size
    dst = np.arange(out_size, dtype=np.float64)
    src = np.maximum(scale * (dst + 0.5) - 0.5, 0.0)
    i0 = np.minimum(np.floor(src).astype(np.int64), in_size - 1)
    i1 = np.minimum(i0 + 1, in_size - 1)
    l1 = src - i0
    l0 = 1.0 - l1
    return i0, i1, l0, l1


def _bilinear_matrix(out_size, in_size):
    i0, i1, l0, l1 = _bilinear_coeffs(out_size, in_size)
    R = np.zeros((out_size, in_size), dtype=np.float32)
    np.add.at(R, (np.arange(out_size), i0), l0)
    np.add.at(R, (np.arange(out_size), i1), l1)
    return R


# ---------------------------------------------------------------------------
# Kernel factory: one batch element per grid step, all refs are 2D/3D VMEM.
# ---------------------------------------------------------------------------
def _make_kernel(Hh, Wh, Sh, nc, h_i0, h_i1, needs_h1):
    inv_sh = 1.0 / float(Sh)

    def kernel(high_ref, low_ref, w_cbr_ref, b_cbr_ref, w_scale_ref,
               w_low_ref, w_high_ref, bias_ref, rwb_ref, hw0_ref, hw1_ref,
               out_ref):
        # f32 HBM activations -> bf16 on the VPU (single HBM read per input).
        high = high_ref[...].astype(jnp.bfloat16)            # (Sh, Ch)
        low = low_ref[...].astype(jnp.bfloat16)              # (Sl, Cl)

        # --- cbr: 1x1 conv (BN folded in) + ReLU -> (Sh, Ci) f32 ------------
        x = jnp.dot(high, w_cbr_ref[...], preferred_element_type=jnp.float32)
        x = jnp.maximum(x + b_cbr_ref[...], 0.0)

        # --- scale: global avg pool as an MXU ones-row reduction ------------
        ones_row = jnp.ones((1, Sh), dtype=jnp.bfloat16)
        pooled = inv_sh * jnp.dot(ones_row, high,
                                  preferred_element_type=jnp.float32)  # (1, Ch)
        s = jax.nn.sigmoid(
            jnp.dot(pooled.astype(jnp.bfloat16), w_scale_ref[...],
                    preferred_element_type=jnp.float32))     # (1, Ci) f32

        # --- gate, then high classifier BEFORE upsampling (both linear) -----
        gated = (x * s).astype(jnp.bfloat16)                 # (Sh, Ci)
        z = jnp.dot(gated, w_high_ref[...],
                    preferred_element_type=jnp.float32)      # (Sh, nc) f32

        # --- separable bilinear upsample: width pass (batched MXU, bf16) ----
        # NOTE: reshape is layout-free only when Wh % 8 == 0 (true here);
        # otherwise it costs one VMEM relayout of z.
        z3 = z.astype(jnp.bfloat16).reshape(Hh, Wh, nc)
        t = jnp.einsum("bqk,bkd->bqd", rwb_ref[...], z3,
                       preferred_element_type=jnp.float32)   # (Hh, Wl, nc) f32

        # --- height pass: vectorized static-gather lerp on the VPU ----------
        t0 = jnp.concatenate([t[i] for i in h_i0], axis=0)   # (Sl, nc)
        up = hw0_ref[...] * t0
        if needs_h1:
            t1 = jnp.concatenate([t[i] for i in h_i1], axis=0)
            up = up + hw1_ref[...] * t1

        # --- low classifier + folded bias; ONE fused whole-block store ------
        base = jnp.dot(low, w_low_ref[...],
                       preferred_element_type=jnp.float32) + bias_ref[...]
        out_ref[...] = (base + up).astype(out_ref.dtype)

    return kernel


# ---------------------------------------------------------------------------
# Wrapper
# ---------------------------------------------------------------------------
def lraspp_head(high, low, params):
    N, Hh, Wh, Ch = high.shape
    N2, Hl, Wl, Cl = low.shape
    assert N == N2
    Ci = params["w_cbr"].shape[1]
    nc = params["w_low"].shape[1]
    Sh, Sl = Hh * Wh, Hl * Wl

    # static separable-bilinear data (PyTorch align_corners=False)
    hi0, hi1, hl0, hl1 = _bilinear_coeffs(Hl, Hh)
    h_i0 = [int(v) for v in hi0]
    h_i1 = [int(v) for v in hi1]
    needs_h1 = bool(np.any(np.asarray(hl1) != 0.0))
    hw0 = jnp.asarray(np.repeat(np.asarray(hl0, np.float32), Wl)[:, None])  # (Sl,1)
    hw1 = jnp.asarray(np.repeat(np.asarray(hl1, np.float32), Wl)[:, None])  # (Sl,1)
    # Pre-broadcast Rw over the Hh batch once (tiny bf16 constant input)
    # instead of a per-grid-step broadcast_to inside the kernel.
    rw_b = jnp.broadcast_to(
        jnp.asarray(_bilinear_matrix(Wl, Wh), dtype=jnp.bfloat16)[None],
        (Hh, Wl, Wh))

    # weights: bf16 for the MXU (f32 accumulation in-kernel), biases folded
    bf16 = jnp.bfloat16
    w_cbr = params["w_cbr"].astype(bf16)                      # (Ch, Ci)
    b_cbr = params["b_cbr"].astype(jnp.float32)               # (1, Ci)
    w_scale = params["w_scale"].astype(bf16)                  # (Ch, Ci)
    w_low = params["w_low"].astype(bf16)                      # (Cl, nc)
    w_high = params["w_high"].astype(bf16)                    # (Ci, nc)
    bias = (params["b_low"] + params["b_high"]).astype(jnp.float32)  # (1, nc)

    # activations: channels-last 2D slabs, left in f32 (cast happens in-kernel)
    high2 = high.reshape(N, Sh, Ch)
    low2 = low.reshape(N, Sl, Cl)

    kernel = _make_kernel(Hh, Wh, Sh, nc, h_i0, h_i1, needs_h1)
    c2 = lambda shape: pl.BlockSpec(shape, lambda n: (0, 0))
    c3 = lambda shape: pl.BlockSpec(shape, lambda n: (0, 0, 0))

    # Explicit VMEM budget: double-buffered blocks + constants + headroom for
    # the (lane-padded) f32 intermediates, clamped to a range that is valid on
    # v5e / v6e (128 MiB physical) and v7x (64 MiB physical, 32 MiB scoped).
    blk = 2 * (Sh * Ch * 4 + Sl * Cl * 4 + Sl * nc * 2)
    consts = (2 * Ch * Ci * 2 + Ci * 4 + Cl * nc * 2 + Ci * nc * 2 + nc * 4
              + Hh * Wl * Wh * 2 + 2 * Sl * 4)
    interm = 4 * (2 * Sh * max(Ci, LANE) + 6 * Sl * max(nc, LANE))
    vmem_limit = int(min(64 << 20,
                         max(32 << 20, blk + 2 * consts + interm + (4 << 20))))

    out = pl.pallas_call(
        kernel,
        out_shape=jax.ShapeDtypeStruct((N, Sl, nc), jnp.bfloat16),
        grid_spec=pltpu.PrefetchScalarGridSpec(
            num_scalar_prefetch=0,
            grid=(N,),
            in_specs=[
                pl.BlockSpec((None, Sh, Ch), lambda n: (n, 0, 0)),   # high f32
                pl.BlockSpec((None, Sl, Cl), lambda n: (n, 0, 0)),   # low  f32
                c2((Ch, Ci)),       # w_cbr (BN folded)
                c2((1, Ci)),        # b_cbr (BN folded)
                c2((Ch, Ci)),       # w_scale
                c2((Cl, nc)),       # w_low
                c2((Ci, nc)),       # w_high
                c2((1, nc)),        # folded b_low + b_high
                c3((Hh, Wl, Wh)),   # pre-broadcast width interp matrix (bf16)
                c2((Sl, 1)),        # height lerp weight 0
                c2((Sl, 1)),        # height lerp weight 1
            ],
            out_specs=pl.BlockSpec((None, Sl, nc), lambda n: (n, 0, 0)),
        ),
        compiler_params=pltpu.CompilerParams(
            dimension_semantics=("parallel",),
            vmem_limit_bytes=vmem_limit),
    )(high2, low2, w_cbr, b_cbr, w_scale, w_low, w_high, bias, rw_b, hw0, hw1)

    return out.reshape(N, Hl, Wl, nc)


# ---------------------------------------------------------------------------
# Pure-JAX reference (same NHWC layout, f32) for the correctness check
# ---------------------------------------------------------------------------
def lraspp_reference(high, low, params):
    N, Hh, Wh, Ch = high.shape
    _, Hl, Wl, _ = low.shape
    Rh = jnp.asarray(_bilinear_matrix(Hl, Hh))
    Rw = jnp.asarray(_bilinear_matrix(Wl, Wh))
    hp = jax.lax.Precision.HIGHEST
    x = jnp.maximum(
        jnp.einsum("nhwc,cd->nhwd", high, params["w_cbr"], precision=hp)
        + params["b_cbr"], 0.0)
    pooled = jnp.mean(high, axis=(1, 2))
    s = jax.nn.sigmoid(
        jnp.einsum("nc,cd->nd", pooled, params["w_scale"], precision=hp))
    x = x * s[:, None, None, :]
    up = jnp.einsum("oh,pw,nhwc->nopc", Rh, Rw, x, precision=hp)
    return (jnp.einsum("nhwc,cd->nhwd", low, params["w_low"], precision=hp)
            + params["b_low"]
            + jnp.einsum("nhwc,cd->nhwd", up, params["w_high"], precision=hp)
            + params["b_high"])


# ---------------------------------------------------------------------------
# Deterministic parameter construction (synthetic; mirrors __init__ shapes)
# ---------------------------------------------------------------------------
def make_params(key, low_channels, high_channels, num_classes, inter_channels):
    ks = jax.random.split(key, 10)
    # conv weights, PyTorch layout (Cout, Cin, 1, 1) -> stored as (Cin, Cout)
    w_cbr_conv = jax.random.normal(ks[0], (inter_channels, high_channels)) * 0.1
    bn_gamma = 1.0 + 0.1 * jax.random.normal(ks[1], (inter_channels,))
    bn_beta = 0.1 * jax.random.normal(ks[2], (inter_channels,))
    bn_mean = 0.1 * jax.random.normal(ks[3], (inter_channels,))
    bn_var = jnp.abs(jax.random.normal(ks[4], (inter_channels,))) + 0.5
    eps = 1e-5
    inv_std = bn_gamma / jnp.sqrt(bn_var + eps)
    # fold BN (eval-mode running stats) into the 1x1 conv
    w_cbr = (w_cbr_conv * inv_std[:, None]).T                  # (Ch, Ci)
    b_cbr = (bn_beta - bn_mean * inv_std)[None, :]             # (1, Ci)

    w_scale = (jax.random.normal(ks[5], (inter_channels, high_channels)) * 0.1).T
    w_low = (jax.random.normal(ks[6], (num_classes, low_channels)) * 0.1).T
    b_low = (0.1 * jax.random.normal(ks[7], (num_classes,)))[None, :]
    w_high = (jax.random.normal(ks[8], (num_classes, inter_channels)) * 0.1).T
    b_high = (0.1 * jax.random.normal(ks[9], (num_classes,)))[None, :]

    return dict(w_cbr=w_cbr.astype(jnp.float32), b_cbr=b_cbr.astype(jnp.float32),
                w_scale=w_scale.astype(jnp.float32),
                w_low=w_low.astype(jnp.float32), b_low=b_low.astype(jnp.float32),
                w_high=w_high.astype(jnp.float32), b_high=b_high.astype(jnp.float32))


if __name__ == "__main__":
    # small shapes: batch=2, low_channels=4, high_channels=8, num_classes=3,
    # inter_channels=16, low spatial 16x16, high spatial 8x8
    N, Cl, Ch, nc, Ci = 2, 4, 8, 3, 16
    Hl = Wl = 16
    Hh = Wh = 8

    key = jax.random.PRNGKey(0)
    k_low, k_high, k_par = jax.random.split(key, 3)
    low = jax.random.normal(k_low, (N, Hl, Wl, Cl), dtype=jnp.float32)
    high = jax.random.normal(k_high, (N, Hh, Wh, Ch), dtype=jnp.float32)
    params = make_params(k_par, Cl, Ch, nc, Ci)

    out = jax.block_until_ready(lraspp_head(high, low, params))
    assert out.shape == (N, Hl, Wl, nc)
    assert out.dtype == jnp.bfloat16

    # Reference on bf16-quantized inputs/weights (kernel runs its matmuls in
    # bf16 with f32 accumulation; biases stay f32; output is bf16).
    q = lambda a: a.astype(jnp.bfloat16).astype(jnp.float32)
    params_q = dict(params)
    for k in ("w_cbr", "w_scale", "w_low", "w_high"):
        params_q[k] = q(params[k])
    ref = jax.block_until_ready(lraspp_reference(q(high), q(low), params_q))

    np.testing.assert_allclose(np.asarray(out.astype(jnp.float32)),
                               np.asarray(ref), rtol=2e-2, atol=2e-2)
    print("KERNEL_OK")
</pallas_src>

<mosaic_0001>
module attributes {stable_mosaic.version = 11 : i64} {
  func.func @kernel(%arg0: i32, %arg1: memref<1x64x8xf32, #tpu.memory_space<vmem>>, %arg2: memref<1x256x4xf32, #tpu.memory_space<vmem>>, %arg3: memref<8x16xbf16, #tpu.memory_space<vmem>>, %arg4: memref<1x16xf32, #tpu.memory_space<vmem>>, %arg5: memref<8x16xbf16, #tpu.memory_space<vmem>>, %arg6: memref<4x3xbf16, #tpu.memory_space<vmem>>, %arg7: memref<16x3xbf16, #tpu.memory_space<vmem>>, %arg8: memref<1x3xf32, #tpu.memory_space<vmem>>, %arg9: memref<8x16x8xbf16, #tpu.memory_space<vmem>>, %arg10: memref<256x1xf32, #tpu.memory_space<vmem>>, %arg11: memref<256x1xf32, #tpu.memory_space<vmem>>, %arg12: memref<1x256x3xbf16, #tpu.memory_space<vmem>>) attributes {dimension_semantics = [#tpu.dimension_semantics<parallel>], iteration_bounds = array<i64: 2>, scalar_prefetch = 0 : i64, scratch_operands = 0 : i64, tpu.core_type = #tpu.core_type<tc>, window_params = [{transform_indices = @transform_0, window_bounds = array<i64: 1, 64, 8>}, {transform_indices = @transform_1, window_bounds = array<i64: 1, 256, 4>}, {pipeline_mode = #tpu.pipeline_mode<synchronous>, transform_indices = @transform_2, window_bounds = array<i64: 8, 16>}, {pipeline_mode = #tpu.pipeline_mode<synchronous>, transform_indices = @transform_3, window_bounds = array<i64: 1, 16>}, {pipeline_mode = #tpu.pipeline_mode<synchronous>, transform_indices = @transform_4, window_bounds = array<i64: 8, 16>}, {pipeline_mode = #tpu.pipeline_mode<synchronous>, transform_indices = @transform_5, window_bounds = array<i64: 4, 3>}, {pipeline_mode = #tpu.pipeline_mode<synchronous>, transform_indices = @transform_6, window_bounds = array<i64: 16, 3>}, {pipeline_mode = #tpu.pipeline_mode<synchronous>, transform_indices = @transform_7, window_bounds = array<i64: 1, 3>}, {pipeline_mode = #tpu.pipeline_mode<synchronous>, transform_indices = @transform_8, window_bounds = array<i64: 8, 16, 8>}, {pipeline_mode = #tpu.pipeline_mode<synchronous>, transform_indices = @transform_9, window_bounds = array<i64: 256, 1>}, {pipeline_mode = #tpu.pipeline_mode<synchronous>, transform_indices = @transform_10, window_bounds = array<i64: 256, 1>}, {transform_indices = @transform_11, window_bounds = array<i64: 1, 256, 3>}]} {
    %c0 = arith.constant 0 : index
    %c0_0 = arith.constant 0 : index
    %c0_1 = arith.constant 0 : index
    %0 = vector.load %arg1[%c0, %c0_0, %c0_1] : memref<1x64x8xf32, #tpu.memory_space<vmem>>, vector<1x64x8xf32>
    %1 = vector.shape_cast %0 : vector<1x64x8xf32> to vector<64x8xf32>
    %2 = arith.truncf %1 : vector<64x8xf32> to vector<64x8xbf16>
    %c0_2 = arith.constant 0 : index
    %c0_3 = arith.constant 0 : index
    %c0_4 = arith.constant 0 : index
    %3 = vector.load %arg2[%c0_2, %c0_3, %c0_4] : memref<1x256x4xf32, #tpu.memory_space<vmem>>, vector<1x256x4xf32>
    %4 = vector.shape_cast %3 : vector<1x256x4xf32> to vector<256x4xf32>
    %5 = arith.truncf %4 : vector<256x4xf32> to vector<256x4xbf16>
    %c0_5 = arith.constant 0 : index
    %c0_6 = arith.constant 0 : index
    %6 = vector.load %arg3[%c0_5, %c0_6] : memref<8x16xbf16, #tpu.memory_space<vmem>>, vector<8x16xbf16>
    %cst = arith.constant dense<0.000000e+00> : vector<64x16xf32>
    %7 = tpu.matmul %2, %6, %cst {dimension_numbers = #tpu.dot_dimension_numbers<[1], [0], [0], [1], [0, 0, 1, 1], [], []>} : vector<64x8xbf16>, vector<8x16xbf16>, vector<64x16xf32> -> vector<64x16xf32>
    %c0_7 = arith.constant 0 : index
    %c0_8 = arith.constant 0 : index
    %8 = vector.load %arg4[%c0_7, %c0_8] : memref<1x16xf32, #tpu.memory_space<vmem>>, vector<1x16xf32>
    %9 = vector.broadcast %8 : vector<1x16xf32> to vector<64x16xf32>
    %10 = arith.addf %7, %9 : vector<64x16xf32>
    %cst_9 = arith.constant 0.000000e+00 : f32
    %11 = vector.broadcast %cst_9 : f32 to vector<64x16xf32>
    %12 = arith.maximumf %10, %11 : vector<64x16xf32>
    %cst_10 = arith.constant 1.000000e+00 : bf16
    %13 = vector.broadcast %cst_10 : bf16 to vector<1x64xbf16>
    %cst_11 = arith.constant dense<0.000000e+00> : vector<1x8xf32>
    %14 = tpu.matmul %13, %2, %cst_11 {dimension_numbers = #tpu.dot_dimension_numbers<[1], [0], [0], [1], [0, 0, 1, 1], [], []>} : vector<1x64xbf16>, vector<64x8xbf16>, vector<1x8xf32> -> vector<1x8xf32>
    %cst_12 = arith.constant 1.562500e-02 : f32
    %15 = vector.broadcast %cst_12 : f32 to vector<1x8xf32>
    %16 = arith.mulf %15, %14 : vector<1x8xf32>
    %17 = arith.truncf %16 : vector<1x8xf32> to vector<1x8xbf16>
    %c0_13 = arith.constant 0 : index
    %c0_14 = arith.constant 0 : index
    %18 = vector.load %arg5[%c0_13, %c0_14] : memref<8x16xbf16, #tpu.memory_space<vmem>>, vector<8x16xbf16>
    %cst_15 = arith.constant dense<0.000000e+00> : vector<1x16xf32>
    %19 = tpu.matmul %17, %18, %cst_15 {dimension_numbers = #tpu.dot_dimension_numbers<[1], [0], [0], [1], [0, 0, 1, 1], [], []>} : vector<1x8xbf16>, vector<8x16xbf16>, vector<1x16xf32> -> vector<1x16xf32>
    %20 = arith.negf %19 : vector<1x16xf32>
    %21 = math.exp %20 : vector<1x16xf32>
    %cst_16 = arith.constant 1.000000e+00 : f32
    %22 = vector.broadcast %cst_16 : f32 to vector<1x16xf32>
    %23 = arith.addf %22, %21 : vector<1x16xf32>
    %24 = arith.divf %22, %23 : vector<1x16xf32>
    %25 = vector.broadcast %24 : vector<1x16xf32> to vector<64x16xf32>
    %26 = arith.mulf %12, %25 : vector<64x16xf32>
    %27 = arith.truncf %26 : vector<64x16xf32> to vector<64x16xbf16>
    %c0_17 = arith.constant 0 : index
    %c0_18 = arith.constant 0 : index
    %28 = vector.load %arg7[%c0_17, %c0_18] : memref<16x3xbf16, #tpu.memory_space<vmem>>, vector<16x3xbf16>
    %cst_19 = arith.constant dense<0.000000e+00> : vector<64x3xf32>
    %29 = tpu.matmul %27, %28, %cst_19 {dimension_numbers = #tpu.dot_dimension_numbers<[1], [0], [0], [1], [0, 0, 1, 1], [], []>} : vector<64x16xbf16>, vector<16x3xbf16>, vector<64x3xf32> -> vector<64x3xf32>
    %30 = arith.truncf %29 : vector<64x3xf32> to vector<64x3xbf16>
    %31 = vector.shape_cast %30 : vector<64x3xbf16> to vector<8x8x3xbf16>
    %c0_20 = arith.constant 0 : index
    %c0_21 = arith.constant 0 : index
    %c0_22 = arith.constant 0 : index
    %32 = vector.load %arg9[%c0_20, %c0_21, %c0_22] : memref<8x16x8xbf16, #tpu.memory_space<vmem>>, vector<8x16x8xbf16>
    "tpu.trace_start"() <{level = 10 : i32, message = "bqk,bkd->bqd"}> : () -> ()
    %cst_23 = arith.constant dense<0.000000e+00> : vector<8x16x3xf32>
    %33 = tpu.matmul %32, %31, %cst_23 {dimension_numbers = #tpu.dot_dimension_numbers<[2], [1], [1], [2], [0, 0, 0, 1, 1, 2], [0], [0]>} : vector<8x16x8xbf16>, vector<8x8x3xbf16>, vector<8x16x3xf32> -> vector<8x16x3xf32>
    "tpu.trace_stop"() : () -> ()
    %34 = vector.extract_strided_slice %33 {offsets = [0, 0, 0], sizes = [1, 16, 3], strides = [1, 1, 1]} : vector<8x16x3xf32> to vector<1x16x3xf32>
    %35 = vector.shape_cast %34 : vector<1x16x3xf32> to vector<16x3xf32>
    %36 = vector.extract_strided_slice %33 {offsets = [0, 0, 0], sizes = [1, 16, 3], strides = [1, 1, 1]} : vector<8x16x3xf32> to vector<1x16x3xf32>
    %37 = vector.shape_cast %36 : vector<1x16x3xf32> to vector<16x3xf32>
    %38 = vector.extract_strided_slice %33 {offsets = [0, 0, 0], sizes = [1, 16, 3], strides = [1, 1, 1]} : vector<8x16x3xf32> to vector<1x16x3xf32>
    %39 = vector.shape_cast %38 : vector<1x16x3xf32> to vector<16x3xf32>
    %40 = vector.extract_strided_slice %33 {offsets = [1, 0, 0], sizes = [1, 16, 3], strides = [1, 1, 1]} : vector<8x16x3xf32> to vector<1x16x3xf32>
    %41 = vector.shape_cast %40 : vector<1x16x3xf32> to vector<16x3xf32>
    %42 = vector.extract_strided_slice %33 {offsets = [1, 0, 0], sizes = [1, 16, 3], strides = [1, 1, 1]} : vector<8x16x3xf32> to vector<1x16x3xf32>
    %43 = vector.shape_cast %42 : vector<1x16x3xf32> to vector<16x3xf32>
    %44 = vector.extract_strided_slice %33 {offsets = [2, 0, 0], sizes = [1, 16, 3], strides = [1, 1, 1]} : vector<8x16x3xf32> to vector<1x16x3xf32>
    %45 = vector.shape_cast %44 : vector<1x16x3xf32> to vector<16x3xf32>
    %46 = vector.extract_strided_slice %33 {offsets = [2, 0, 0], sizes = [1, 16, 3], strides = [1, 1, 1]} : vector<8x16x3xf32> to vector<1x16x3xf32>
    %47 = vector.shape_cast %46 : vector<1x16x3xf32> to vector<16x3xf32>
    %48 = vector.extract_strided_slice %33 {offsets = [3, 0, 0], sizes = [1, 16, 3], strides = [1, 1, 1]} : vector<8x16x3xf32> to vector<1x16x3xf32>
    %49 = vector.shape_cast %48 : vector<1x16x3xf32> to vector<16x3xf32>
    %50 = vector.extract_strided_slice %33 {offsets = [3, 0, 0], sizes = [1, 16, 3], strides = [1, 1, 1]} : vector<8x16x3xf32> to vector<1x16x3xf32>
    %51 = vector.shape_cast %50 : vector<1x16x3xf32> to vector<16x3xf32>
    %52 = vector.extract_strided_slice %33 {offsets = [4, 0, 0], sizes = [1, 16, 3], strides = [1, 1, 1]} : vector<8x16x3xf32> to vector<1x16x3xf32>
    %53 = vector.shape_cast %52 : vector<1x16x3xf32> to vector<16x3xf32>
    %54 = vector.extract_strided_slice %33 {offsets = [4, 0, 0], sizes = [1, 16, 3], strides = [1, 1, 1]} : vector<8x16x3xf32> to vector<1x16x3xf32>
    %55 = vector.shape_cast %54 : vector<1x16x3xf32> to vector<16x3xf32>
    %56 = vector.extract_strided_slice %33 {offsets = [5, 0, 0], sizes = [1, 16, 3], strides = [1, 1, 1]} : vector<8x16x3xf32> to vector<1x16x3xf32>
    %57 = vector.shape_cast %56 : vector<1x16x3xf32> to vector<16x3xf32>
    %58 = vector.extract_strided_slice %33 {offsets = [5, 0, 0], sizes = [1, 16, 3], strides = [1, 1, 1]} : vector<8x16x3xf32> to vector<1x16x3xf32>
    %59 = vector.shape_cast %58 : vector<1x16x3xf32> to vector<16x3xf32>
    %60 = vector.extract_strided_slice %33 {offsets = [6, 0, 0], sizes = [1, 16, 3], strides = [1, 1, 1]} : vector<8x16x3xf32> to vector<1x16x3xf32>
    %61 = vector.shape_cast %60 : vector<1x16x3xf32> to vector<16x3xf32>
    %62 = vector.extract_strided_slice %33 {offsets = [6, 0, 0], sizes = [1, 16, 3], strides = [1, 1, 1]} : vector<8x16x3xf32> to vector<1x16x3xf32>
    %63 = vector.shape_cast %62 : vector<1x16x3xf32> to vector<16x3xf32>
    %64 = vector.extract_strided_slice %33 {offsets = [7, 0, 0], sizes = [1, 16, 3], strides = [1, 1, 1]} : vector<8x16x3xf32> to vector<1x16x3xf32>
    %65 = vector.shape_cast %64 : vector<1x16x3xf32> to vector<16x3xf32>
    %66 = tpu.concatenate %35, %37, %39, %41, %43, %45, %47, %49, %51, %53, %55, %57, %59, %61, %63, %65 in 0 : vector<16x3xf32>, vector<16x3xf32>, vector<16x3xf32>, vector<16x3xf32>, vector<16x3xf32>, vector<16x3xf32>, vector<16x3xf32>, vector<16x3xf32>, vector<16x3xf32>, vector<16x3xf32>, vector<16x3xf32>, vector<16x3xf32>, vector<16x3xf32>, vector<16x3xf32>, vector<16x3xf32>, vector<16x3xf32> -> vector<256x3xf32>
    %c0_24 = arith.constant 0 : index
    %c0_25 = arith.constant 0 : index
    %67 = vector.load %arg10[%c0_24, %c0_25] : memref<256x1xf32, #tpu.memory_space<vmem>>, vector<256x1xf32>
    %68 = vector.broadcast %67 : vector<256x1xf32> to vector<256x3xf32>
    %69 = arith.mulf %68, %66 : vector<256x3xf32>
    %70 = vector.extract_strided_slice %33 {offsets = [1, 0, 0], sizes = [1, 16, 3], strides = [1, 1, 1]} : vector<8x16x3xf32> to vector<1x16x3xf32>
    %71 = vector.shape_cast %70 : vector<1x16x3xf32> to vector<16x3xf32>
    %72 = vector.extract_strided_slice %33 {offsets = [1, 0, 0], sizes = [1, 16, 3], strides = [1, 1, 1]} : vector<8x16x3xf32> to vector<1x16x3xf32>
    %73 = vector.shape_cast %72 : vector<1x16x3xf32> to vector<16x3xf32>
    %74 = vector.extract_strided_slice %33 {offsets = [1, 0, 0], sizes = [1, 16, 3], strides = [1, 1, 1]} : vector<8x16x3xf32> to vector<1x16x3xf32>
    %75 = vector.shape_cast %74 : vector<1x16x3xf32> to vector<16x3xf32>
    %76 = vector.extract_strided_slice %33 {offsets = [2, 0, 0], sizes = [1, 16, 3], strides = [1, 1, 1]} : vector<8x16x3xf32> to vector<1x16x3xf32>
    %77 = vector.shape_cast %76 : vector<1x16x3xf32> to vector<16x3xf32>
    %78 = vector.extract_strided_slice %33 {offsets = [2, 0, 0], sizes = [1, 16, 3], strides = [1, 1, 1]} : vector<8x16x3xf32> to vector<1x16x3xf32>
    %79 = vector.shape_cast %78 : vector<1x16x3xf32> to vector<16x3xf32>
    %80 = vector.extract_strided_slice %33 {offsets = [3, 0, 0], sizes = [1, 16, 3], strides = [1, 1, 1]} : vector<8x16x3xf32> to vector<1x16x3xf32>
    %81 = vector.shape_cast %80 : vector<1x16x3xf32> to vector<16x3xf32>
    %82 = vector.extract_strided_slice %33 {offsets = [3, 0, 0], sizes = [1, 16, 3], strides = [1, 1, 1]} : vector<8x16x3xf32> to vector<1x16x3xf32>
    %83 = vector.shape_cast %82 : vector<1x16x3xf32> to vector<16x3xf32>
    %84 = vector.extract_strided_slice %33 {offsets = [4, 0, 0], sizes = [1, 16, 3], strides = [1, 1, 1]} : vector<8x16x3xf32> to vector<1x16x3xf32>
    %85 = vector.shape_cast %84 : vector<1x16x3xf32> to vector<16x3xf32>
    %86 = vector.extract_strided_slice %33 {offsets = [4, 0, 0], sizes = [1, 16, 3], strides = [1, 1, 1]} : vector<8x16x3xf32> to vector<1x16x3xf32>
    %87 = vector.shape_cast %86 : vector<1x16x3xf32> to vector<16x3xf32>
    %88 = vector.extract_strided_slice %33 {offsets = [5, 0, 0], sizes = [1, 16, 3], strides = [1, 1, 1]} : vector<8x16x3xf32> to vector<1x16x3xf32>
    %89 = vector.shape_cast %88 : vector<1x16x3xf32> to vector<16x3xf32>
    %90 = vector.extract_strided_slice %33 {offsets = [5, 0, 0], sizes = [1, 16, 3], strides = [1, 1, 1]} : vector<8x16x3xf32> to vector<1x16x3xf32>
    %91 = vector.shape_cast %90 : vector<1x16x3xf32> to vector<16x3xf32>
    %92 = vector.extract_strided_slice %33 {offsets = [6, 0, 0], sizes = [1, 16, 3], strides = [1, 1, 1]} : vector<8x16x3xf32> to vector<1x16x3xf32>
    %93 = vector.shape_cast %92 : vector<1x16x3xf32> to vector<16x3xf32>
    %94 = vector.extract_strided_slice %33 {offsets = [6, 0, 0], sizes = [1, 16, 3], strides = [1, 1, 1]} : vector<8x16x3xf32> to vector<1x16x3xf32>
    %95 = vector.shape_cast %94 : vector<1x16x3xf32> to vector<16x3xf32>
    %96 = vector.extract_strided_slice %33 {offsets = [7, 0, 0], sizes = [1, 16, 3], strides = [1, 1, 1]} : vector<8x16x3xf32> to vector<1x16x3xf32>
    %97 = vector.shape_cast %96 : vector<1x16x3xf32> to vector<16x3xf32>
    %98 = vector.extract_strided_slice %33 {offsets = [7, 0, 0], sizes = [1, 16, 3], strides = [1, 1, 1]} : vector<8x16x3xf32> to vector<1x16x3xf32>
    %99 = vector.shape_cast %98 : vector<1x16x3xf32> to vector<16x3xf32>
    %100 = vector.extract_strided_slice %33 {offsets = [7, 0, 0], sizes = [1, 16, 3], strides = [1, 1, 1]} : vector<8x16x3xf32> to vector<1x16x3xf32>
    %101 = vector.shape_cast %100 : vector<1x16x3xf32> to vector<16x3xf32>
    %102 = tpu.concatenate %71, %73, %75, %77, %79, %81, %83, %85, %87, %89, %91, %93, %95, %97, %99, %101 in 0 : vector<16x3xf32>, vector<16x3xf32>, vector<16x3xf32>, vector<16x3xf32>, vector<16x3xf32>, vector<16x3xf32>, vector<16x3xf32>, vector<16x3xf32>, vector<16x3xf32>, vector<16x3xf32>, vector<16x3xf32>, vector<16x3xf32>, vector<16x3xf32>, vector<16x3xf32>, vector<16x3xf32>, vector<16x3xf32> -> vector<256x3xf32>
    %c0_26 = arith.constant 0 : index
    %c0_27 = arith.constant 0 : index
    %103 = vector.load %arg11[%c0_26, %c0_27] : memref<256x1xf32, #tpu.memory_space<vmem>>, vector<256x1xf32>
    %104 = vector.broadcast %103 : vector<256x1xf32> to vector<256x3xf32>
    %105 = arith.mulf %104, %102 : vector<256x3xf32>
    %106 = arith.addf %69, %105 : vector<256x3xf32>
    %c0_28 = arith.constant 0 : index
    %c0_29 = arith.constant 0 : index
    %107 = vector.load %arg6[%c0_28, %c0_29] : memref<4x3xbf16, #tpu.memory_space<vmem>>, vector<4x3xbf16>
    %cst_30 = arith.constant dense<0.000000e+00> : vector<256x3xf32>
    %108 = tpu.matmul %5, %107, %cst_30 {dimension_numbers = #tpu.dot_dimension_numbers<[1], [0], [0], [1], [0, 0, 1, 1], [], []>} : vector<256x4xbf16>, vector<4x3xbf16>, vector<256x3xf32> -> vector<256x3xf32>
    %c0_31 = arith.constant 0 : index
    %c0_32 = arith.constant 0 : index
    %109 = vector.load %arg8[%c0_31, %c0_32] : memref<1x3xf32, #tpu.memory_space<vmem>>, vector<1x3xf32>
    %110 = vector.broadcast %109 : vector<1x3xf32> to vector<256x3xf32>
    %111 = arith.addf %108, %110 : vector<256x3xf32>
    %112 = arith.addf %111, %106 : vector<256x3xf32>
    %113 = arith.truncf %112 : vector<256x3xf32> to vector<256x3xbf16>
    %c0_33 = arith.constant 0 : index
    %c0_34 = arith.constant 0 : index
    %c0_35 = arith.constant 0 : index
    %114 = vector.load %arg12[%c0_33, %c0_34, %c0_35] : memref<1x256x3xbf16, #tpu.memory_space<vmem>>, vector<1x256x3xbf16>
    %115 = vector.shape_cast %114 : vector<1x256x3xbf16> to vector<256x3xbf16>
    %116 = vector.shape_cast %113 : vector<256x3xbf16> to vector<1x256x3xbf16>
    tpu.vector_store %arg12[%c0_33, %c0_34, %c0_35], %116 {strides = array<i32>} : memref<1x256x3xbf16, #tpu.memory_space<vmem>>, vector<1x256x3xbf16>,
    return
  }
  func.func @transform_0(%arg0: i32) -> (i32, i32, i32) {
    %c0_i32 = arith.constant 0 : i32
    %c0_i32_0 = arith.constant 0 : i32
    %c0_i32_1 = arith.constant 0 : i32
    return %arg0, %c0_i32, %c0_i32_0 : i32, i32, i32
  }
  func.func @transform_1(%arg0: i32) -> (i32, i32, i32) {
    %c0_i32 = arith.constant 0 : i32
    %c0_i32_0 = arith.constant 0 : i32
    %c0_i32_1 = arith.constant 0 : i32
    return %arg0, %c0_i32, %c0_i32_0 : i32, i32, i32
  }
  func.func @transform_2(%arg0: i32) -> (i32, i32) {
    %c0_i32 = arith.constant 0 : i32
    %c0_i32_0 = arith.constant 0 : i32
    %c0_i32_1 = arith.constant 0 : i32
    return %c0_i32, %c0_i32_0 : i32, i32
  }
  func.func @transform_3(%arg0: i32) -> (i32, i32) {
    %c0_i32 = arith.constant 0 : i32
    %c0_i32_0 = arith.constant 0 : i32
    %c0_i32_1 = arith.constant 0 : i32
    return %c0_i32, %c0_i32_0 : i32, i32
  }
  func.func @transform_4(%arg0: i32) -> (i32, i32) {
    %c0_i32 = arith.constant 0 : i32
    %c0_i32_0 = arith.constant 0 : i32
    %c0_i32_1 = arith.constant 0 : i32
    return %c0_i32, %c0_i32_0 : i32, i32
  }
  func.func @transform_5(%arg0: i32) -> (i32, i32) {
    %c0_i32 = arith.constant 0 : i32
    %c0_i32_0 = arith.constant 0 : i32
    %c0_i32_1 = arith.constant 0 : i32
    return %c0_i32, %c0_i32_0 : i32, i32
  }
  func.func @transform_6(%arg0: i32) -> (i32, i32) {
    %c0_i32 = arith.constant 0 : i32
    %c0_i32_0 = arith.constant 0 : i32
    %c0_i32_1 = arith.constant 0 : i32
    return %c0_i32, %c0_i32_0 : i32, i32
  }
  func.func @transform_7(%arg0: i32) -> (i32, i32) {
    %c0_i32 = arith.constant 0 : i32
    %c0_i32_0 = arith.constant 0 : i32
    %c0_i32_1 = arith.constant 0 : i32
    return %c0_i32, %c0_i32_0 : i32, i32
  }
  func.func @transform_8(%arg0: i32) -> (i32, i32, i32) {
    %c0_i32 = arith.constant 0 : i32
    %c0_i32_0 = arith.constant 0 : i32
    %c0_i32_1 = arith.constant 0 : i32
    %c0_i32_2 = arith.constant 0 : i32
    return %c0_i32, %c0_i32_0, %c0_i32_1 : i32, i32, i32
  }
  func.func @transform_9(%arg0: i32) -> (i32, i32) {
    %c0_i32 = arith.constant 0 : i32
    %c0_i32_0 = arith.constant 0 : i32
    %c0_i32_1 = arith.constant 0 : i32
    return %c0_i32, %c0_i32_0 : i32, i32
  }
  func.func @transform_10(%arg0: i32) -> (i32, i32) {
    %c0_i32 = arith.constant 0 : i32
    %c0_i32_0 = arith.constant 0 : i32
    %c0_i32_1 = arith.constant 0 : i32
    return %c0_i32, %c0_i32_0 : i32, i32
  }
  func.func @transform_11(%arg0: i32) -> (i32, i32, i32) {
    %c0_i32 = arith.constant 0 : i32
    %c0_i32_0 = arith.constant 0 : i32
    %c0_i32_1 = arith.constant 0 : i32
    return %arg0, %c0_i32, %c0_i32_0 : i32, i32, i32
  }
}

</mosaic_0001>

<bundles_post_ra>
// kernel: tpu_custom_call.1
= control target key start
LH: loop header
LB: loop body
LE: loop exit
PB: predicated region body
PF: predicated region fallthrough
CT: control target
= control target key end

     0   :  { %s1851_s17 = smov 0   ;;  %s2557_s0 = inlined_call_operand.vmem [shape: f32[2,64,8], index: 0, kind: input, shape index: {}]   ;;  %s2558_s1 = inlined_call_operand.vmem [shape: f32[2,256,4], index: 1, kind: input, shape index: {}]   ;;  %s2559_s2 = inlined_call_operand.vmem [shape: bf16[8,16], index: 2, kind: input, shape index: {}]   ;;  %s2560_s3 = inlined_call_operand.vmem [shape: f32[1,16], index: 3, kind: input, shape index: {}]   ;;  %s2561_s4 = inlined_call_operand.vmem [shape: bf16[8,16], index: 4, kind: input, shape index: {}]   ;;  %s2562_s5 = inlined_call_operand.vmem [shape: bf16[4,3], index: 5, kind: input, shape index: {}]   ;;  %s2563_s6 = inlined_call_operand.vmem [shape: bf16[16,3], index: 6, kind: input, shape index: {}]   ;;  %s2564_s7 = inlined_call_operand.vmem [shape: f32[1,3], index: 7, kind: input, shape index: {}]   ;;  %s2565_s8 = inlined_call_operand.vmem [shape: bf16[8,16,8], index: 8, kind: input, shape index: {}]   ;;  %s2566_s9 = inlined_call_operand.vmem [shape: f32[256,1], index: 9, kind: input, shape index: {}]   ;;  %s2567_s10 = inlined_call_operand.vmem [shape: f32[256,1], index: 10, kind: input, shape index: {}]   ;;  %s2568_s11 = inlined_call_operand.vmem [shape: bf16[2,256,3], index: 11, kind: output, shape index: {}]  }
   0x1 LB: > { %s1664_s18 = sadd.s32 4294967295, %s1787_s17   ;;  %p1668_p0 = scmp.ge.s32.totalorder %s1787_s17, 1  ;;  %s1787_s17 = sphi %s1851_s17, %s21_s17  }
   0x2   : > { %p347_p1 = scmp.lt.s32.totalorder %s1787_s17, 3 }
   0x4   : > { %p348_p2 = pnand %p1668_p0, %p347_p1 }
   0x6   : > { %351 = sbr.rel (%p348_p2) target bundleno = 769 (0x301), region = 64 }
   0xb   : > { %p392_p3 = scmp.lt.s32.totalorder %s1664_s18, 1  ;;  %v469_v0 = vld [vmem:[%s2559_s2] sm:$0xf]  ;;  %vm487_vm0 = vcmask 1043456   ;;  %vm474_vm1 = vcmask 64512   ;;  %vm528_vm2 = vcmask 523264  }
   0xc   : > { %v547_v1 = vld [vmem:[%s2561_s4] sm:$0xf]  ;;  %v489_v2 = vsel %vm487_vm0, %v469_v0, 0  ;;  %v1789_v16 = vmov 1065369472   ;;  %v1790_v27 = vmov 0  }
   0xd   : > { %s2594_s18 = smov (!%p392_p3, %s1664_s18), 1  ;;  %v552_v3 = vsel %vm487_vm0, %v547_v1, 0  ;;  %498 = vmatpush.bf16.msra.mxu2 %v489_v2  ;;  %1772 = vset.pattern.permute.xlu0 %v1790_v27  ;;  %v873_v28 = vld [vmem:[%s2566_s9] sm:$0xff]  ;;  %v874_v30 = vld [vmem:[%s2566_s9 + $0x8] sm:$0xff]  ;;  %v875_v32 = vld [vmem:[%s2566_s9 + $0x10] sm:$0xff]  ;;  %vm607_vm7 = vcmask 130048  }
   0xe   : > { %s1748_s23 = sshll.u32 %s2594_s18, 6  ;;  %1773 = vset.pattern.permute.xlu1 %v1790_v27  ;;  %907 = vperm.xlu0 %1772, %v873_v28   ;;  %v879_v33 = vld [vmem:[%s2566_s9 + $0x30] sm:$0xff]  ;;  %v1751_v34 = vld [vmem:[%s2563_s6] sm:$0xff]  ;;  %v876_v37 = vld [vmem:[%s2566_s9 + $0x18] sm:$0xff]  ;;  %vm1407_vm8 = vcmask 1041408   ;;  %s1749_s12 = sshll.u32 %s2594_s18, 8 }
   0xf   : > { %s396_s26 = scalar_lea.vmem %s2557_s0, %s1748_s23  ;;  %1774 = vset.pattern.permute.xlu2 %v1790_v27  ;;  %917 = vperm.xlu1 %1773, %v875_v32   ;;  %v882_v38 = vld [vmem:[%s2566_s9 + $0x48] sm:$0xff]  ;;  %v880_v42 = vld [vmem:[%s2566_s9 + $0x38] sm:$0xff]  ;;  %v885_v43 = vld [vmem:[%s2566_s9 + $0x60] sm:$0xff]  ;;  %s2067_s19 = scalar_lea.vmem %s2558_s1, %s1749_s12  ;;  %vm1358_vm9 = vcmask 31744   ;;  %vm1564_vm10 = vcmask 19456  }
  0x10   : > { %v415_v4 = vld [vmem:[%s396_s26 + $0x30] sm:$0xff]  ;;  %v416_v5 = vld [vmem:[%s396_s26 + $0x38] sm:$0xff]  ;;  %v413_v6 = vld [vmem:[%s396_s26 + $0x20] sm:$0xff]  ;;  %627 = vmatpush.bf16.msra.mxu3 %v1751_v34  ;;  %s1750_s12 = sshll.u32 %s2594_s18, 7 }
  0x11   : > { %561 = vmatpush.bf16.msrb.mxu2 %v552_v3  ;;  %v420_v7 = vpack.c.bf16 %v416_v5, %v415_v4  ;;  %v414_v8 = vld [vmem:[%s396_s26 + $0x28] sm:$0xff]  ;;  %v409_v9 = vld [vmem:[%s396_s26] sm:$0xff]  ;;  %v411_v13 = vld [vmem:[%s396_s26 + $0x10] sm:$0xff]  ;;  %s2386_s15 = scalar_lea.vmem %s2568_s11, %s1750_s12 }
  0x12   : > { %v410_v10 = vld [vmem:[%s396_s26 + $0x8] sm:$0xff]  ;;  %v419_v11 = vpack.c.bf16 %v414_v8, %v413_v6  ;;  %v412_v14 = vld [vmem:[%s396_s26 + $0x18] sm:$0xff]  ;;  %v877_v46 = vld [vmem:[%s2566_s9 + $0x20] sm:$0xff] }
  0x13   : > { %536 = vmatpush.bf16.msra.mxu1 %v420_v7  ;;  %v417_v12 = vpack.c.bf16 %v410_v10, %v409_v9  ;;  %v418_v15 = vpack.c.bf16 %v412_v14, %v411_v13  ;;  %v883_v47 = vld [vmem:[%s2566_s9 + $0x50] sm:$0xff]  ;;  %v888_v48 = vld [vmem:[%s2566_s9 + $0x78] sm:$0xff]  ;;  %v1921_v49 = vld [vmem:[%s2560_s3] ss:$0 sm:$0xff]  ;;  %927 = vperm.xlu2 %1774, %v877_v46  }
  0x14   : > { %v878_v59 = vld [vmem:[%s2566_s9 + $0x28] sm:$0xff]  ;;  %v891_v1 = vld [vmem:[%s2566_s9 + $0x90] sm:$0xff]  ;;  %v900_v27 = vld [vmem:[%s2566_s9 + $0xd8] sm:$0xff] }
  0x15   : > { %1675 = vmatmul.msk.bf16.vlgmr.msra.gmra.mxu2 %vm474_vm1, %v417_v12  ;;  %v886_v0 = vld [vmem:[%s2566_s9 + $0x68] sm:$0xff]  ;;  %v903_v32 = vld [vmem:[%s2566_s9 + $0xf0] sm:$0xff]  ;;  %v901_v34 = vld [vmem:[%s2566_s9 + $0xe0] sm:$0xff] }
  0x16   : > { %912 = vperm.xlu0 %1772, %v874_v30   ;;  %v890_v28 = vld [vmem:[%s2566_s9 + $0x88] sm:$0xff]  ;;  %v1104_v46 = vld [vmem:[%s2567_s10 + $0x38] sm:$0xff] }
  0x17   : > { %537 = vmatpush.bf16.msra.mxu1 %v419_v11  ;;  %922 = vperm.xlu1 %1773, %v876_v37   ;;  %v898_v30 = vld [vmem:[%s2566_s9 + $0xc8] sm:$0xff] }
  0x1b   : > { %538 = vmatpush.bf16.msra.mxu1 %v418_v15  ;;  %932 = vperm.xlu2 %1774, %v878_v59   ;;  %v1111_v59 = vld [vmem:[%s2567_s10 + $0x70] sm:$0xff] }
  0x1e   : > { %937 = vperm.xlu0 %1772, %v879_v33   ;;  %v893_v33 = vld [vmem:[%s2566_s9 + $0xa0] sm:$0xff] }
  0x1f   : > { %539 = vmatpush.bf16.msra.mxu1 %v417_v12  ;;  %942 = vperm.xlu1 %1773, %v880_v42   ;;  %v1101_v42 = vld [vmem:[%s2567_s10 + $0x20] sm:$0xff] }
  0x22   : > { %1679 = vmatmul.msk.bf16.vlgmr.msra.gmra.mxu1 %vm528_vm2, %v1789_v16 }
  0x25   : > { %1676 = vmatmul.msk.bf16.gmra.mxu2 %vm474_vm1, %v418_v15 }
  0x26   : > { %952 = vperm.xlu0 %1772, %v882_v38   ;;  %v896_v38 = vld [vmem:[%s2566_s9 + $0xb8] sm:$0xff] }
  0x27   : > { %957 = vperm.xlu1 %1773, %v883_v47   ;;  %v902_v47 = vld [vmem:[%s2566_s9 + $0xe8] sm:$0xff] }
  0x2e   : > { %967 = vperm.xlu0 %1772, %v885_v43  }
  0x2f   : > { %972 = vperm.xlu1 %1773, %v886_v0   ;;  %v1109_v0 = vld [vmem:[%s2567_s10 + $0x60] sm:$0xff] }
  0x35   : > { %1677 = vmatmul.msk.bf16.gmra.mxu2 %vm474_vm1, %v419_v11 }
  0x36   : > { %982 = vperm.xlu0 %1772, %v888_v48   ;;  %v1102_v48 = vld [vmem:[%s2567_s10 + $0x28] sm:$0xff] }
  0x3e   : > { %997 = vperm.xlu0 %1772, %v891_v1   ;;  %v1117_v1 = vld [vmem:[%s2567_s10 + $0xa0] sm:$0xff] }
  0x45   : > { %1678 = vmatmul.msk.bf16.gmra.mxu2 %vm474_vm1, %v420_v7 }
  0x98   : > { %v500_v21 = vpop.f32.mrf.mxu2 }
  0x99   : > { %v501_v54 = vadd.f32 %v1921_v49, %v500_v21  ;;  %v894_v21 = vld [vmem:[%s2566_s9 + $0xa8] sm:$0xff] }
  0x9a   : > { %1012 = vperm.xlu0 %1772, %v894_v21   ;;  %v448_v21 = vld [vmem:[%s2067_s19 + $0xd8] sm:$0xff] }
  0x9b   : > { %v520_v2 = vmax.f32 %v501_v54, 0.0  ;;  %v1110_v54 = vld [vmem:[%s2567_s10 + $0x68] sm:$0xff] }
  0x9f   : > { %v541_v17 = vpop.f32.mrf.mxu1 }
  0xa0   : > { %v545_v18 = vmul.f32 0.015625, %v541_v17  ;;  %v502_v22 = vpop.f32.mrf.mxu2 }
  0xa1   : > { %v503_v55 = vadd.f32 %v1921_v49, %v502_v22  ;;  %v884_v22 = vld [vmem:[%s2566_s9 + $0x58] sm:$0xff] }
  0xa2   : > { %v546_v19 = vpack.c.bf16 %v545_v18, %v545_v18 }
  0xa3   : > { %v521_v4 = vmax.f32 %v503_v55, 0.0  ;;  %v1100_v55 = vld [vmem:[%s2567_s10 + $0x18] sm:$0xff] }
  0xa4   : > { %1680 = vmatmul.msk.bf16.vlgmr.msrb.gmra.mxu2 %vm474_vm1, %v546_v19  ;;  %v881_v19 = vld [vmem:[%s2566_s9 + $0x40] sm:$0xff] }
  0xa5   : > { %947 = vperm.xlu2 %1774, %v881_v19   ;;  %v1121_v19 = vld [vmem:[%s2567_s10 + $0xc0] sm:$0xff] }
  0xa7   : > { %v543_v20 = vpop.f32.mrf.mxu1 }
  0xa8   : > { %v505_v23 = vpop.f32.mrf.mxu2  ;;  %v889_v20 = vld [vmem:[%s2566_s9 + $0x80] sm:$0xff] }
  0xa9   : > { %v506_v56 = vadd.f32 %v1921_v49, %v505_v23  ;;  %987 = vperm.xlu1 %1773, %v889_v20   ;;  %v892_v23 = vld [vmem:[%s2566_s9 + $0x98] sm:$0xff]  ;;  %v447_v20 = vld [vmem:[%s2067_s19 + $0xd0] sm:$0xff] }
  0xab   : > { %v522_v5 = vmax.f32 %v506_v56, 0.0  ;;  %v1108_v56 = vld [vmem:[%s2567_s10 + $0x58] sm:$0xff] }
  0xad   : > { %962 = vperm.xlu2 %1774, %v884_v22  }
  0xb0   : > { %v507_v24 = vpop.f32.mrf.mxu2 }
  0xb1   : > { %v508_v57 = vadd.f32 %v1921_v49, %v507_v24  ;;  %v897_v24 = vld [vmem:[%s2566_s9 + $0xc0] sm:$0xff]  ;;  %1002 = vperm.xlu1 %1773, %v892_v23   ;;  %v466_v23 = vpack.c.bf16 %v448_v21, %v447_v20  ;;  %v1759_v21 = vld [vmem:[%s2565_s8 + $0x38] sm:$0xff] }
  0xb2   : > { %1027 = vperm.xlu0 %1772, %v897_v24  }
  0xb3   : > { %v523_v6 = vmax.f32 %v508_v57, 0.0  ;;  %v1113_v57 = vld [vmem:[%s2567_s10 + $0x80] sm:$0xff] }
  0xb8   : > { %v510_v25 = vpop.f32.mrf.mxu2 }
  0xb9   : > { %v511_v60 = vadd.f32 %v1921_v49, %v510_v25  ;;  %v887_v25 = vld [vmem:[%s2566_s9 + $0x70] sm:$0xff] }
  0xba   : > { %977 = vperm.xlu2 %1774, %v887_v25   ;;  %1042 = vperm.xlu0 %1772, %v900_v27  }
  0xbb   : > { %v524_v8 = vmax.f32 %v511_v60, 0.0  ;;  %v1116_v60 = vld [vmem:[%s2567_s10 + $0x98] sm:$0xff] }
  0xc0   : > { %v512_v26 = vpop.f32.mrf.mxu2 }
  0xc1   : > { %v513_v61 = vadd.f32 %v1921_v49, %v512_v26  ;;  %v895_v26 = vld [vmem:[%s2566_s9 + $0xb0] sm:$0xff] }
  0xc2   : > { %1017 = vperm.xlu1 %1773, %v895_v26   ;;  %992 = vperm.xlu2 %1774, %v890_v28   ;;  %v2116_v26 = vpop.permute.xlu1 %917  ;;  %v1752_v28 = vld [vmem:[%s2565_s8] sm:$0xff] }
  0xc3   : > { %v525_v9 = vmax.f32 %v513_v61, 0.0  ;;  %1057 = vperm.xlu0 %1772, %v903_v32   ;;  %v1106_v61 = vld [vmem:[%s2567_s10 + $0x48] sm:$0xff]  ;;  %v1124_v32 = vld [vmem:[%s2567_s10 + $0xd8] sm:$0xff] }
  0xc8   : > { %v1881_v29 = vpop.f32.mrf.mxu2 }
  0xca   : > { %1032 = vperm.xlu1 %1773, %v898_v30   ;;  %1007 = vperm.xlu2 %1774, %v893_v33  }
  0xd0   : > { %v1886_v31 = vpop.f32.mrf.mxu2 }
  0xd1   : > { %v518_v37 = vadd.f32 %v1921_v49, %v1886_v31 }
  0xd2   : > { %1047 = vperm.xlu1 %1773, %v901_v34   ;;  %1022 = vperm.xlu2 %1774, %v896_v38   ;;  %v2135_v38 = vpop.permute.xlu1 %922 }
 0x127   : > { %v563_v35 = vpop.f32.mrf.mxu2 }
 0x128   : > { %v1681_v36 = vmul.f32 -1.442695, %v563_v35  ;;  %v1098_v35 = vld [vmem:[%s2567_s10 + $0x8] sm:$0xff] }
 0x129   : > { %1136 = vperm.xlu0 %1772, %v1098_v35  }
 0x12a   : > { %1777 = vpow2.f32 %v1681_v36  ;;  %v516_v36 = vadd.f32 %v1921_v49, %v1881_v29  ;;  %v1107_v49 = vld [vmem:[%s2567_s10 + $0x50] sm:$0xff] }
 0x12f   : > { %v565_v39 = vpop.f32.mrf.mxu2 }
 0x130   : > { %v1778_v40 = vpop.eup %1777  ;;  %v526_v39 = vmax.f32 %v516_v36, 0.0 }
 0x131   : > { %v570_v41 = vadd.f32 1.0, %v1778_v40  ;;  %v527_v40 = vmax.f32 %v518_v37, 0.0  ;;  %1151 = vperm.xlu0 %1772, %v1101_v42   ;;  %v1753_v37 = vld [vmem:[%s2565_s8 + $0x8] sm:$0xff] }
 0x132   : > { %v450_v42 = vld [vmem:[%s2067_s19 + $0xe8] sm:$0xff] }
 0x133   : > { %1779 = vrcp.f32 %v570_v41  ;;  %v582_v51 = vand.u32 2147483648, %v570_v41  ;;  %v580_v53 = vand.u32 2147483647, %v570_v41  ;;  %vm576_vm4 = vweird.f32 %v570_v41 }
 0x135   : > { %v583_v62 = vor.u32 1.1754944e-38, %v582_v51  ;;  %vm581_vm6 = vcmp.eq.f32.partialorder %v580_v53, 8.507059e+37  ;;  %v1097_v51 = vld [vmem:[%s2567_s10] sm:$0xff] }
 0x136   : > { %v1105_v53 = vld [vmem:[%s2567_s10 + $0x40] sm:$0xff] }
 0x139   : > { %v1780_v44 = vpop.eup %1779  ;;  %1166 = vperm.xlu0 %1772, %v1104_v46  }
 0x13a   : > { %v572_v45 = vmul.f32 %v1780_v44, %v570_v41  ;;  %vm577_vm3 = vweird.f32 %v1780_v44  ;;  %v904_v41 = vld [vmem:[%s2566_s9 + $0xf8] sm:$0xff] }
 0x13b   : > { %vm578_vm5 = vmor %vm576_vm4, %vm577_vm3  ;;  %1062 = vperm.xlu1 %1773, %v904_v41   ;;  %v449_v41 = vld [vmem:[%s2067_s19 + $0xe0] sm:$0xff] }
 0x13c   : > { %v573_v50 = vsub.f32 1.0, %v572_v45  ;;  %v1099_v45 = vld [vmem:[%s2567_s10 + $0x10] sm:$0xff] }
 0x13e   : > { %v574_v52 = vmul.f32 %v1780_v44, %v573_v50  ;;  %v1353_v50 = vld [vmem:[%s2562_s5] sm:$0x3] }
 0x140   : > { %v575_v58 = vadd.f32 %v1780_v44, %v574_v52  ;;  %v2024_v52 = vsel %vm1407_vm8, %v1353_v50, 0 }
 0x141   : > { %1181 = vperm.xlu0 %1772, %v1107_v49   ;;  %1761 = vmatpush.bf16.msrb.mxu3 %v2024_v52 }
 0x142   : > { %v579_v63 = vsel %vm578_vm5, %v1780_v44, %v575_v58  ;;  %v899_v44 = vld [vmem:[%s2566_s9 + $0xd0] sm:$0xff] }
 0x143   : > { %v584_v3 = vsel %vm581_vm6, %v583_v62, %v579_v63  ;;  %1037 = vperm.xlu2 %1774, %v899_v44   ;;  %1141 = vperm.xlu1 %1773, %v1099_v45   ;;  %v1103_v58 = vld [vmem:[%s2567_s10 + $0x30] sm:$0xff]  ;;  %v1114_v62 = vld [vmem:[%s2567_s10 + $0x88] sm:$0xff] }
 0x144   : > { %v586_v7 = vperm.slane %v584_v3, 0  ;;  %v1119_v63 = vld [vmem:[%s2567_s10 + $0xb0] sm:$0xff] }
 0x145   : > { %v443_v3 = vld [vmem:[%s2067_s19 + $0xb0] sm:$0xff] }
 0x146   : > { %v587_v10 = vmul.f32 %v586_v7, %v520_v2  ;;  %v588_v11 = vmul.f32 %v586_v7, %v521_v4  ;;  %v589_v12 = vmul.f32 %v586_v7, %v522_v5  ;;  %v590_v13 = vmul.f32 %v586_v7, %v523_v6  ;;  %v1122_v2 = vld [vmem:[%s2567_s10 + $0xc8] sm:$0xff]  ;;  %v444_v4 = vld [vmem:[%s2067_s19 + $0xb8] sm:$0xff]  ;;  %v1754_v45 = vld [vmem:[%s2565_s8 + $0x10] sm:$0xff] }
 0x147   : > { %v591_v14 = vmul.f32 %v586_v7, %v524_v8  ;;  %v592_v15 = vmul.f32 %v586_v7, %v525_v9  ;;  %v593_v43 = vmul.f32 %v586_v7, %v526_v39  ;;  %v594_v29 = vmul.f32 %v586_v7, %v527_v40  ;;  %v1112_v6 = vld [vmem:[%s2567_s10 + $0x78] sm:$0xff]  ;;  %v1125_v8 = vld [vmem:[%s2567_s10 + $0xe0] sm:$0xff]  ;;  %v1115_v9 = vld [vmem:[%s2567_s10 + $0x90] sm:$0xff] }
 0x148   : > { %v595_v16 = vpack.c.bf16 %v588_v11, %v587_v10  ;;  %v596_v17 = vpack.c.bf16 %v590_v13, %v589_v12  ;;  %v464_v5 = vpack.c.bf16 %v444_v4, %v443_v3  ;;  %v1120_v7 = vld [vmem:[%s2567_s10 + $0xb8] sm:$0xff]  ;;  %v1123_v10 = vld [vmem:[%s2567_s10 + $0xd0] sm:$0xff]  ;;  %v445_v12 = vld [vmem:[%s2067_s19 + $0xc0] sm:$0xff] }
 0x149   : > { %v597_v18 = vpack.c.bf16 %v592_v15, %v591_v14  ;;  %v598_v31 = vpack.c.bf16 %v594_v29, %v593_v43  ;;  %1196 = vperm.xlu0 %1772, %v1110_v54   ;;  %v1128_v11 = vld [vmem:[%s2567_s10 + $0xf8] sm:$0xff]  ;;  %v446_v13 = vld [vmem:[%s2067_s19 + $0xc8] sm:$0xff]  ;;  %v2099_v15 = vpop.permute.xlu0 %907  ;;  %v1127_v40 = vld [vmem:[%s2567_s10 + $0xf0] sm:$0xff]  ;;  %v467_v29 = vpack.c.bf16 %v450_v42, %v449_v41 }
 0x14a   : > { %1686 = vmatmul.msk.bf16.vlgmr.msra.gmra.mxu3 %vm607_vm7, %v595_v16  ;;  %v465_v14 = vpack.c.bf16 %v446_v13, %v445_v12  ;;  %v1118_v16 = vld [vmem:[%s2567_s10 + $0xa8] sm:$0xff]  ;;  %v423_v42 = vld [vmem:[%s2067_s19 + $0x10] sm:$0xff] }
 0x14b   : > { %1052 = vperm.xlu2 %1774, %v902_v47   ;;  %1156 = vperm.xlu1 %1773, %v1102_v48   ;;  %v2152_v47 = vpop.permute.xlu1 %942 }
 0x151   : > { %1211 = vperm.xlu0 %1772, %v1113_v57   ;;  %v2114_v24 = vpop.permute.xlu0 %912 }
 0x153   : > { %1131 = vperm.xlu2 %1774, %v1097_v51   ;;  %1171 = vperm.xlu1 %1773, %v1105_v53   ;;  %v1755_v53 = vld [vmem:[%s2565_s8 + $0x18] sm:$0xff]  ;;  %v2166_v57 = vpop.permute.xlu1 %957 }
 0x159   : > { %1226 = vperm.xlu0 %1772, %v1116_v60   ;;  %v2129_v35 = vpop.permute.xlu0 %937 }
 0x15a   : > { %1687 = vmatmul.msk.bf16.gmra.mxu3 %vm607_vm7, %v596_v17  ;;  %v1126_v17 = vld [vmem:[%s2567_s10 + $0xe8] sm:$0xff] }
 0x15b   : > { %1146 = vperm.xlu2 %1774, %v1100_v55   ;;  %1186 = vperm.xlu1 %1773, %v1108_v56   ;;  %v451_v55 = vld [vmem:[%s2067_s19 + $0xf0] sm:$0xff]  ;;  %v452_v56 = vld [vmem:[%s2067_s19 + $0xf8] sm:$0xff]  ;;  %v2178_v3 = vpop.permute.xlu1 %972 }
 0x161   : > { %1241 = vperm.xlu0 %1772, %v1119_v63   ;;  %v2150_v46 = vpop.permute.xlu0 %952  ;;  %v1756_v63 = vld [vmem:[%s2565_s8 + $0x20] sm:$0xff] }
 0x163   : > { %1161 = vperm.xlu2 %1774, %v1103_v58   ;;  %1201 = vperm.xlu1 %1773, %v1111_v59   ;;  %v468_v59 = vpack.c.bf16 %v452_v56, %v451_v55  ;;  %v2194_v12 = vpop.permute.xlu1 %987 }
 0x169   : > { %1256 = vperm.xlu0 %1772, %v1122_v2   ;;  %v2161_v54 = vpop.permute.xlu0 %967 }
 0x16a   : > { %1688 = vmatmul.msk.bf16.gmra.mxu3 %vm607_vm7, %v597_v18  ;;  %v2107_v18 = vpop.permute.xlu2 %927 }
 0x16b   : > { %1176 = vperm.xlu2 %1774, %v1106_v61   ;;  %1216 = vperm.xlu1 %1773, %v1114_v62  }
 0x171   : > { %1271 = vperm.xlu0 %1772, %v1125_v8  }
 0x172   : > { %v2123_v30 = vpop.permute.xlu2 %932 }
 0x173   : > { %1191 = vperm.xlu2 %1774, %v1109_v0   ;;  %1231 = vperm.xlu1 %1773, %v1117_v1   ;;  %v2176_v1 = vpop.permute.xlu0 %982 }
 0x179   : > { %1286 = vperm.xlu0 %1772, %v1128_v11   ;;  %v1758_v11 = vld [vmem:[%s2565_s8 + $0x30] sm:$0xff] }
 0x17a   : > { %1689 = vmatmul.msk.bf16.gmra.mxu3 %vm607_vm7, %v598_v31  ;;  %v2137_v39 = vpop.permute.xlu2 %947 }
 0x17b   : > { %1206 = vperm.xlu2 %1774, %v1112_v6   ;;  %1246 = vperm.xlu1 %1773, %v1120_v7  }
 0x182   : > { %v2155_v49 = vpop.permute.xlu2 %962 }
 0x183   : > { %1221 = vperm.xlu2 %1774, %v1115_v9   ;;  %1261 = vperm.xlu1 %1773, %v1123_v10   ;;  %v2188_v9 = vpop.permute.xlu0 %997 }
 0x18a   : > { %1741 = vmatmul.msk.bf16.vlgmr.msrb.gmra.mxu3 %vm1358_vm9, %v464_v5  ;;  %v2168_v61 = vpop.permute.xlu2 %977  ;;  %v1757_v5 = vld [vmem:[%s2565_s8 + $0x28] sm:$0xff] }
 0x18b   : > { %1236 = vperm.xlu2 %1774, %v1118_v16   ;;  %1276 = vperm.xlu1 %1773, %v1126_v17   ;;  %v435_v16 = vld [vmem:[%s2067_s19 + $0x70] sm:$0xff]  ;;  %v436_v17 = vld [vmem:[%s2067_s19 + $0x78] sm:$0xff] }
 0x192   : > { %v2184_v6 = vpop.permute.xlu2 %992 }
 0x193   : > { %1251 = vperm.xlu2 %1774, %v1121_v19  }
 0x19a   : > { %1742 = vmatmul.msk.bf16.gmra.mxu3 %vm1358_vm9, %v465_v14  ;;  %v2197_v13 = vpop.permute.xlu2 %1007 }
 0x19b   : > { %1266 = vperm.xlu2 %1774, %v1124_v32   ;;  %2569 = vst [vmem:[#allocation2_spill] sm:$0xff] %v2197_v13 }
 0x1a3   : > { %1281 = vperm.xlu2 %1774, %v1127_v40  }
 0x1aa   : > { %1743 = vmatmul.msk.bf16.gmra.mxu3 %vm1358_vm9, %v466_v23  ;;  %v2208_v23 = vpop.permute.xlu1 %1002 }
 0x1ab   : > { %2571 = vst [vmem:[#allocation4_spill] sm:$0xff] %v2208_v23 }
 0x1ba   : > { %1744 = vmatmul.msk.bf16.gmra.mxu3 %vm1358_vm9, %v467_v29 }
 0x1ca   : > { %1745 = vmatmul.msk.bf16.gmra.mxu3 %vm1358_vm9, %v468_v59  ;;  %v426_v59 = vld [vmem:[%s2067_s19 + $0x28] sm:$0xff] }
 0x1cd   : > { %v629_v22 = vpop.f32.mrf.mxu3 }
 0x1ce   : > { %v649_v25 = vpack.c.bf16 %v629_v22, %v629_v22  ;;  %v460_v22 = vpack.c.bf16 %v436_v17, %v435_v16 }
 0x1d0   : > { %v682_v27 = vsel %vm487_vm0, %v649_v25, 0  ;;  %v421_v25 = vld [vmem:[%s2067_s19] sm:$0xff] }
 0x1d1   : > { %691 = vmatpush.bf16.msra.mxu2 %v682_v27  ;;  %v422_v27 = vld [vmem:[%s2067_s19 + $0x8] sm:$0xff] }
 0x1d2   : > { %v453_v32 = vpack.c.bf16 %v422_v27, %v421_v25  ;;  %v429_v25 = vld [vmem:[%s2067_s19 + $0x40] sm:$0xff]  ;;  %v430_v27 = vld [vmem:[%s2067_s19 + $0x48] sm:$0xff] }
 0x1d4   : > { %1694 = vmatmul.msk.bf16.vlgmr.msra.gmra.mxu2 %vm474_vm1, %v1752_v28  ;;  %v2214_v28 = vpop.permute.xlu2 %1022 }
 0x1d5   : > { %v631_v33 = vpop.f32.mrf.mxu3 }
 0x1d6   : > { %v650_v34 = vpack.c.bf16 %v631_v33, %v631_v33 }
 0x1d8   : > { %v707_v36 = vsel %vm487_vm0, %v650_v34, 0  ;;  %v2219_v34 = vpop.permute.xlu1 %1017 }
 0x1d9   : > { %716 = vmatpush.bf16.msrb.mxu1 %v707_v36  ;;  %v437_v36 = vld [vmem:[%s2067_s19 + $0x80] sm:$0xff] }
 0x1dc   : > { %1699 = vmatmul.msk.bf16.vlgmr.msrb.gmra.mxu1 %vm474_vm1, %v1753_v37  ;;  %v438_v37 = vld [vmem:[%s2067_s19 + $0x88] sm:$0xff]  ;;  %v2223_v40 = vpop.permute.xlu2 %1037 }
 0x1dd   : > { %v634_v43 = vpop.f32.mrf.mxu3  ;;  %v461_v41 = vpack.c.bf16 %v438_v37, %v437_v36  ;;  %v457_v36 = vpack.c.bf16 %v430_v27, %v429_v25 }
 0x1de   : > { %v651_v31 = vpack.c.bf16 %v634_v43, %v634_v43  ;;  %v424_v43 = vld [vmem:[%s2067_s19 + $0x18] sm:$0xff] }
 0x1e0   : > { %v732_v44 = vsel %vm487_vm0, %v651_v31, 0  ;;  %v2230_v31 = vpop.permute.xlu1 %1032 }
 0x1e1   : > { %741 = vmatpush.bf16.msrb.mxu2 %v732_v44  ;;  %v454_v44 = vpack.c.bf16 %v424_v43, %v423_v42 }
 0x1e4   : > { %1704 = vmatmul.msk.bf16.vlgmr.msrb.gmra.mxu2 %vm474_vm1, %v1754_v45  ;;  %v2232_v45 = vpop.permute.xlu2 %1052 }
 0x1e5   : > { %v636_v48 = vpop.f32.mrf.mxu3 }
 0x1e6   : > { %v652_v50 = vpack.c.bf16 %v636_v48, %v636_v48  ;;  %v439_v48 = vld [vmem:[%s2067_s19 + $0x90] sm:$0xff] }
 0x1e8   : > { %v757_v51 = vsel %vm487_vm0, %v652_v50, 0  ;;  %v440_v50 = vld [vmem:[%s2067_s19 + $0x98] sm:$0xff]  ;;  %v2239_v55 = vpop.permute.xlu1 %1047 }
 0x1e9   : > { %766 = vmatpush.bf16.msra.mxu1 %v757_v51 }
 0x1ec   : > { %1709 = vmatmul.msk.bf16.vlgmr.msra.gmra.mxu1 %vm474_vm1, %v1755_v53  ;;  %v462_v53 = vpack.c.bf16 %v440_v50, %v439_v48  ;;  %v2241_v56 = vpop.permute.xlu2 %1131 }
 0x1ed   : > { %v639_v58 = vpop.f32.mrf.mxu3 }
 0x1ee   : > { %v653_v60 = vpack.c.bf16 %v639_v58, %v639_v58  ;;  %v425_v58 = vld [vmem:[%s2067_s19 + $0x20] sm:$0xff] }
 0x1f0   : > { %v782_v62 = vsel %vm487_vm0, %v653_v60, 0  ;;  %v455_v60 = vpack.c.bf16 %v426_v59, %v425_v58 }
 0x1f1   : > { %791 = vmatpush.bf16.msra.mxu2 %v782_v62 }
 0x1f4   : > { %1714 = vmatmul.msk.bf16.vlgmr.msra.gmra.mxu2 %vm474_vm1, %v1756_v63  ;;  %v2248_v63 = vpop.permute.xlu1 %1062 }
 0x1f5   : > { %v641_v0 = vpop.f32.mrf.mxu3 }
 0x1f6   : > { %v654_v2 = vpack.c.bf16 %v641_v0, %v641_v0  ;;  %v441_v0 = vld [vmem:[%s2067_s19 + $0xa0] sm:$0xff] }
 0x1f8   : > { %v807_v4 = vsel %vm487_vm0, %v654_v2, 0  ;;  %v442_v2 = vld [vmem:[%s2067_s19 + $0xa8] sm:$0xff] }
 0x1f9   : > { %816 = vmatpush.bf16.msrb.mxu1 %v807_v4  ;;  %v1147_v4 = vpop.permute.xlu2 %1146 }
 0x1fc   : > { %1719 = vmatmul.msk.bf16.vlgmr.msrb.gmra.mxu1 %vm474_vm1, %v1757_v5  ;;  %v463_v5 = vpack.c.bf16 %v442_v2, %v441_v0 }
 0x1fd   : > { %1760 = vmatpush.bf16.msra.mxu1 %v2024_v52  ;;  %v644_v7 = vpop.f32.mrf.mxu3 }
 0x1fe   : > { %v655_v8 = vpack.c.bf16 %v644_v7, %v644_v7 }
 0x200   : > { %v832_v10 = vsel %vm487_vm0, %v655_v8, 0 }
 0x201   : > { %841 = vmatpush.bf16.msra.mxu0 %v832_v10  ;;  %v1142_v10 = vpop.permute.xlu1 %1141  ;;  %v1162_v16 = vpop.permute.xlu2 %1161 }
 0x204   : > { %1724 = vmatmul.msk.bf16.vlgmr.msra.gmra.mxu0 %vm474_vm1, %v1758_v11  ;;  %v427_v11 = vld [vmem:[%s2067_s19 + $0x30] sm:$0xff] }
 0x205   : > { %1418 = vmatpush.bf16.msrb.mxu0 %v2024_v52  ;;  %v646_v14 = vpop.f32.mrf.mxu3  ;;  %v2206_v52 = vpop.permute.xlu0 %1012 }
 0x206   : > { %v656_v19 = vpack.c.bf16 %v646_v14, %v646_v14  ;;  %2570 = vst [vmem:[#allocation3_spill] sm:$0xff] %v2206_v52  ;;  %v428_v14 = vld [vmem:[%s2067_s19 + $0x38] sm:$0xff] }
 0x207   : > { %v456_v17 = vpack.c.bf16 %v428_v14, %v427_v11  ;;  %v431_v11 = vld [vmem:[%s2067_s19 + $0x50] sm:$0xff]  ;;  %v432_v14 = vld [vmem:[%s2067_s19 + $0x58] sm:$0xff] }
 0x208   : > { %v857_v20 = vsel %vm487_vm0, %v656_v19, 0 }
 0x209   : > { %866 = vmatpush.bf16.msrb.mxu2 %v857_v20 }
 0x20c   : > { %1729 = vmatmul.msk.bf16.vlgmr.msrb.gmra.mxu2 %vm474_vm1, %v1759_v21  ;;  %1737 = vmatmul.msk.bf16.vlgmr.msra.gmra.mxu1 %vm1358_vm9, %v460_v22  ;;  %v1157_v21 = vpop.permute.xlu1 %1156  ;;  %v1177_v22 = vpop.permute.xlu2 %1176 }
 0x20d   : > { %v2216_v33 = vpop.permute.xlu0 %1027  ;;  %v2254_v8 = vpop.f32.mrf.mxu3 }
 0x214   : > { %1730 = vmatmul.msk.bf16.vlgmr.msrb.gmra.mxu0 %vm1358_vm9, %v453_v32  ;;  %v1192_v42 = vpop.permute.xlu2 %1191 }
 0x215   : > { %v2228_v29 = vpop.permute.xlu0 %1042  ;;  %v2259_v20 = vpop.f32.mrf.mxu3 }
 0x21c   : > { %1738 = vmatmul.msk.bf16.gmra.mxu1 %vm1358_vm9, %v461_v41  ;;  %v1172_v41 = vpop.permute.xlu1 %1171 }
 0x21d   : > { %v2237_v51 = vpop.permute.xlu0 %1057  ;;  %v2263_v37 = vpop.f32.mrf.mxu3 }
 0x224   : > { %1731 = vmatmul.msk.bf16.gmra.mxu0 %vm1358_vm9, %v454_v44  ;;  %v1187_v0 = vpop.permute.xlu1 %1186 }
 0x225   : > { %v2246_v62 = vpop.permute.xlu0 %1136  ;;  %v2274_v58 = vpop.f32.mrf.mxu3 }
 0x22c   : > { %1739 = vmatmul.msk.bf16.gmra.mxu1 %vm1358_vm9, %v462_v53 }
 0x22d   : > { %v1152_v7 = vpop.permute.xlu0 %1151 }
 0x234   : > { %1732 = vmatmul.msk.bf16.gmra.mxu0 %vm1358_vm9, %v455_v60 }
 0x235   : > { %v1167_v19 = vpop.permute.xlu0 %1166 }
 0x23c   : > { %1740 = vmatmul.msk.bf16.gmra.mxu1 %vm1358_vm9, %v463_v5 }
 0x23d   : > { %v1182_v32 = vpop.permute.xlu0 %1181 }
 0x244   : > { %1733 = vmatmul.msk.bf16.gmra.mxu0 %vm1358_vm9, %v456_v17  ;;  %v2284_v17 = vpop.permute.xlu2 %1206 }
 0x245   : > { %v1197_v48 = vpop.permute.xlu0 %1196 }
 0x254   : > { %1734 = vmatmul.msk.bf16.gmra.mxu0 %vm1358_vm9, %v457_v36 }
 0x257   : > { %v2266_v43 = vpop.f32.mrf.mxu2 }
 0x258   : > { %v1067_v50 = vmul.f32 %v2116_v26, %v2266_v43  ;;  %v1069_v53 = vmul.f32 %v2107_v18, %v2266_v43  ;;  %v458_v26 = vpack.c.bf16 %v432_v14, %v431_v11  ;;  %v1202_v11 = vpop.permute.xlu1 %1201  ;;  %v2305_v14 = vpop.permute.xlu2 %1221 }
 0x259   : > { %v2268_v44 = vpop.f32.mrf.mxu1 }
 0x25a   : > { %v1291_v59 = vmul.f32 %v1142_v10, %v2268_v44  ;;  %v1293_v60 = vmul.f32 %v1152_v7, %v2268_v44 }
 0x25c   : > { %v2278_v2 = vadd.f32 %v1291_v59, %v1067_v50  ;;  %v2280_v5 = vadd.f32 %v1293_v60, %v1069_v53  ;;  %v2296_v50 = vpop.permute.xlu0 %1211  ;;  %v2299_v53 = vpop.f32.mrf.mxu3 }
 0x25e   : > { %2572 = vst [vmem:[#allocation5_spill] sm:$0xff] %v2280_v5  ;;  %v434_v5 = vld [vmem:[%s2067_s19 + $0x68] sm:$0xff] }
 0x25f   : > { %v2286_v25 = vpop.f32.mrf.mxu2 }
 0x260   : > { %v1068_v18 = vmul.f32 %v2135_v38, %v2286_v25  ;;  %v1070_v7 = vmul.f32 %v2123_v30, %v2286_v25 }
 0x261   : > { %v2288_v27 = vpop.f32.mrf.mxu1 }
 0x262   : > { %v1292_v10 = vmul.f32 %v1147_v4, %v2288_v27  ;;  %v1294_v36 = vmul.f32 %v1157_v21, %v2288_v27  ;;  %v1071_v21 = vmul.f32 %v2129_v35, %v2268_v44  ;;  %v433_v35 = vld [vmem:[%s2067_s19 + $0x60] sm:$0xff] }
 0x264   : > { %1735 = vmatmul.msk.bf16.gmra.mxu0 %vm1358_vm9, %v458_v26  ;;  %v2301_v59 = vadd.f32 %v1292_v10, %v1068_v18  ;;  %v2303_v60 = vadd.f32 %v1294_v36, %v1070_v7  ;;  %v1073_v26 = vmul.f32 %v2137_v39, %v2268_v44  ;;  %v2327_v23 = vpop.permute.xlu0 %1226  ;;  %v2329_v39 = vpop.f32.mrf.mxu3 }
 0x266   : > { %2573 = vst [vmem:[#allocation6_spill] sm:$0xff] %v2303_v60 }
 0x267   : > { %v743_v38 = vpop.f32.mrf.mxu2 }
 0x268   : > { %v1295_v30 = vmul.f32 %v1162_v16, %v743_v38  ;;  %v1297_v4 = vmul.f32 %v1172_v41, %v743_v38  ;;  %v1075_v18 = vmul.f32 %v2166_v57, %v743_v38  ;;  %v1077_v7 = vmul.f32 %v2161_v54, %v743_v38  ;;  %v2331_v57 = vpop.permute.xlu1 %1216 }
 0x269   : > { %v2307_v52 = vpop.f32.mrf.mxu1 }
 0x26a   : > { %v1299_v10 = vmul.f32 %v1182_v32, %v2307_v52  ;;  %v1301_v36 = vmul.f32 %v1192_v42, %v2307_v52  ;;  %v2317_v60 = vadd.f32 %v1295_v30, %v1071_v21  ;;  %v2319_v16 = vadd.f32 %v1297_v4, %v1073_v26  ;;  %v2339_v26 = vpop.permute.xlu2 %1236 }
 0x26b   : > { %v459_v42 = vpack.c.bf16 %v434_v5, %v433_v35  ;;  %v1072_v4 = vmul.f32 %v2152_v47, %v2288_v27  ;;  %v1074_v21 = vmul.f32 %v2150_v46, %v2288_v27 }
 0x26c   : > { %2574 = vst [vmem:[#allocation7_spill] sm:$0xff] %v2319_v16  ;;  %v2321_v41 = vadd.f32 %v1299_v10, %v1075_v18  ;;  %v2323_v13 = vadd.f32 %v1301_v36, %v1077_v7  ;;  %v1242_v46 = vpop.permute.xlu0 %1241  ;;  %v1490_v35 = vpop.f32.mrf.mxu3 }
 0x26e   : > { %2575 = vst [vmem:[#allocation8_spill] sm:$0xff] %v2321_v41 }
 0x26f   : > { %2576 = vst [vmem:[#allocation9_spill] sm:$0xff] %v2323_v13  ;;  %v745_v54 = vpop.f32.mrf.mxu2 }
 0x270   : > { %v1296_v32 = vmul.f32 %v1167_v19, %v745_v54  ;;  %v1298_v38 = vmul.f32 %v1177_v22, %v745_v54  ;;  %v1076_v18 = vmul.f32 %v2155_v49, %v745_v54  ;;  %v1078_v7 = vmul.f32 %v2178_v3, %v745_v54  ;;  %v2354_v13 = vpop.permute.xlu1 %1231 }
 0x271   : > { %v2333_v30 = vpop.f32.mrf.mxu1 }
 0x272   : > { %v1300_v10 = vmul.f32 %v1187_v0, %v2333_v30  ;;  %v1302_v19 = vmul.f32 %v1197_v48, %v2333_v30  ;;  %v2345_v22 = vadd.f32 %v1296_v32, %v1072_v4  ;;  %v2347_v5 = vadd.f32 %v1298_v38, %v1074_v21  ;;  %v1252_v3 = vpop.permute.xlu2 %1251  ;;  %v2363_v48 = vld [vmem:[%s2564_s7] ss:$0 sm:$0xff] }
 0x273   : > { %v1481_v4 = vadd.f32 %v2363_v48, %v2263_v37 }
 0x274   : > { %2577 = vst [vmem:[#allocation10_spill] sm:$0xff] %v2345_v22  ;;  %1736 = vmatmul.msk.bf16.gmra.mxu0 %vm1358_vm9, %v459_v42  ;;  %v2350_v47 = vadd.f32 %v1300_v10, %v1076_v18  ;;  %v2352_v36 = vadd.f32 %v1302_v19, %v1078_v7  ;;  %v1257_v38 = vpop.permute.xlu0 %1256  ;;  %v1476_v42 = vadd.f32 %v2363_v48, %v2254_v8  ;;  %v2371_v21 = vpop.f32.mrf.mxu3 }
 0x275   : > { %2578 = vst [vmem:[#allocation11_spill] sm:$0xff] %v2347_v5 }
 0x276   : > { %2579 = vst [vmem:[#allocation12_spill] sm:$0xff] %v2350_v47 }
 0x277   : > { %2580 = vst [vmem:[#allocation13_spill] sm:$0xff] %v2352_v36  ;;  %v2358_v0 = vpop.f32.mrf.mxu2 }
 0x278   : > { %v1247_v18 = vpop.permute.xlu1 %1246  ;;  %v1303_v8 = vmul.f32 %v1202_v11, %v2358_v0  ;;  %v1079_v11 = vmul.f32 %v2168_v61, %v2307_v52 }
 0x279   : > { %v2356_v49 = vpop.f32.mrf.mxu1 }
 0x27a   : > { %v1087_v7 = vmul.f32 %v2219_v34, %v2356_v49  ;;  %v1089_v10 = vmul.f32 %v2216_v33, %v2356_v49  ;;  %v2378_v5 = vpop.permute.xlu2 %1266  ;;  %v1478_v33 = vadd.f32 %v2363_v48, %v2259_v20  ;;  %v1483_v34 = vadd.f32 %v2363_v48, %v2274_v58 }
 0x27b   : > { %v1335_v61 = vadd.f32 %v1303_v8, %v1079_v11 }
 0x27f   : > { %v2381_v16 = vpop.f32.mrf.mxu2 }
 0x281   : > { %v2365_v54 = vpop.f32.mrf.mxu1  ;;  %v843_v32 = vpop.f32.mrf.mxu0 }
 0x282   : > { %v1311_v19 = vmul.f32 %v1242_v46, %v843_v32  ;;  %v1313_v36 = vmul.f32 %v1252_v3, %v843_v32  ;;  %v1289_v3 = vmul.f32 %v2241_v56, %v2268_v44  ;;  %v1090_v20 = vmul.f32 %v2230_v31, %v2365_v54  ;;  %v1495_v44 = vpop.f32.mrf.mxu3 }
 0x283   : > { %v1486_v31 = vadd.f32 %v2363_v48, %v2299_v53 }
 0x284   : > { %v1343_v47 = vadd.f32 %v1311_v19, %v1087_v7  ;;  %v1345_v41 = vadd.f32 %v1313_v36, %v1089_v10  ;;  %v1272_v7 = vpop.permute.xlu0 %1271  ;;  %v1065_v10 = vmul.f32 %v2099_v15, %v2266_v43  ;;  %v1262_v19 = vpop.permute.xlu1 %1261  ;;  %v1080_v15 = vmul.f32 %v2176_v1, %v2333_v30 }
 0x285   : > { %v1091_v43 = vmul.f32 %v2223_v40, %v843_v32 }
 0x286   : > { %v1522_v37 = vadd.f32 %v1476_v42, %v1343_v47  ;;  %v1524_v22 = vadd.f32 %v1481_v4, %v1345_v41  ;;  %v1088_v42 = vmul.f32 %v2214_v28, %v2365_v54  ;;  %v1321_v11 = vadd.f32 %v1289_v3, %v1065_v10 }
 0x287   : > { %v1066_v10 = vmul.f32 %v2114_v24, %v2286_v25  ;;  %v1305_v24 = vmul.f32 %v2296_v50, %v2358_v0 }
 0x288   : > { %v1554_v36 = vpack.c.bf16 %v1522_v37, %v1522_v37  ;;  %v1556_v47 = vpack.c.bf16 %v1524_v22, %v1524_v22 }
 0x289   : > { %v2394_v41 = vpop.f32.mrf.mxu0  ;;  %v1455_v46 = vpop.f32.mrf.mxu1 }
 0x28a   : > { %v1312_v58 = vmul.f32 %v1247_v18, %v2394_v41  ;;  %v1314_v4 = vmul.f32 %v1257_v38, %v2394_v41  ;;  %1587 = vst.msk [vmem:[%s2386_s15 + $0x58] sm:$0xf] %vm1564_vm10, %v1554_v36  ;;  %v1456_v22 = vadd.f32 %v2363_v48, %v1455_v46  ;;  %v1304_v38 = vmul.f32 %v2284_v17, %v2381_v16 }
 0x28b   : > { %1589 = vst.msk [vmem:[%s2386_s15 + $0x60] sm:$0xf] %vm1564_vm10, %v1556_v47  ;;  %v1491_v36 = vadd.f32 %v2363_v48, %v1490_v35 }
 0x28c   : > { %v1344_v56 = vadd.f32 %v1312_v58, %v1088_v42  ;;  %v1346_v28 = vadd.f32 %v1314_v4, %v1090_v20  ;;  %v1514_v18 = vadd.f32 %v1456_v22, %v1335_v61  ;;  %v1282_v42 = vpop.permute.xlu2 %1281  ;;  %v1496_v4 = vadd.f32 %v2363_v48, %v1495_v44 }
 0x28d   : > { %v1336_v22 = vadd.f32 %v1304_v38, %v1080_v15 }
 0x28e   : > { %v1523_v8 = vadd.f32 %v1478_v33, %v1344_v56  ;;  %v1525_v37 = vadd.f32 %v1483_v34, %v1346_v28  ;;  %v1546_v47 = vpack.c.bf16 %v1514_v18, %v1514_v18  ;;  %v1093_v33 = vmul.f32 %v2239_v55, %v843_v32 }
 0x28f   : > { %v868_v46 = vpop.f32.mrf.mxu2  ;;  %v1488_v55 = vadd.f32 %v2363_v48, %v2329_v39  ;;  %v1081_v18 = vmul.f32 %v2194_v12, %v2307_v52  ;;  %v1287_v39 = vpop.permute.xlu0 %1286  ;;  %v1094_v12 = vmul.f32 %v2232_v45, %v2394_v41 }
 0x290   : > { %v1555_v53 = vpack.c.bf16 %v1523_v8, %v1523_v8  ;;  %v1557_v20 = vpack.c.bf16 %v1525_v37, %v1525_v37  ;;  %v1095_v58 = vmul.f32 %v2237_v51, %v868_v46  ;;  %v1315_v17 = vmul.f32 %v1262_v19, %v868_v46  ;;  %1579 = vst.msk [vmem:[%s2386_s15 + $0x38] sm:$0xf] %vm1564_vm10, %v1546_v47 }
 0x291   : > { %v1317_v34 = vmul.f32 %v1272_v7, %v868_v46  ;;  %v1319_v1 = vmul.f32 %v1282_v42, %v868_v46  ;;  %v1420_v3 = vpop.f32.mrf.mxu0  ;;  %v1457_v40 = vpop.f32.mrf.mxu1  ;;  %v1290_v19 = vmul.f32 %v2246_v62, %v2288_v27  ;;  %v1092_v8 = vmul.f32 %v2228_v29, %v2394_v41 }
 0x292   : > { %1588 = vst.msk [vmem:[%s2386_s15 + $0x5c] sm:$0xf] %vm1564_vm10, %v1555_v53  ;;  %v1347_v35 = vadd.f32 %v1315_v17, %v1091_v43  ;;  %v1421_v61 = vadd.f32 %v2363_v48, %v1420_v3  ;;  %v1458_v51 = vadd.f32 %v2363_v48, %v1457_v40  ;;  %v1497_v62 = vpop.f32.mrf.mxu3  ;;  %v1277_v27 = vpop.permute.xlu1 %1276  ;;  %v1337_v45 = vadd.f32 %v1305_v24, %v1081_v18 }
 0x293   : > { %1590 = vst.msk [vmem:[%s2386_s15 + $0x64] sm:$0xf] %vm1564_vm10, %v1557_v20  ;;  %v1349_v32 = vadd.f32 %v1317_v34, %v1093_v33  ;;  %v1351_v7 = vadd.f32 %v1319_v1, %v1095_v58  ;;  %v1322_v46 = vadd.f32 %v1290_v19, %v1066_v10  ;;  %v1498_v53 = vadd.f32 %v2363_v48, %v1497_v62  ;;  %v2581_v62 = vld [vmem:[#allocation4_spill] sm:$0xff] }
 0x294   : > { %v1526_v56 = vadd.f32 %v1486_v31, %v1347_v35  ;;  %v1500_v28 = vadd.f32 %v1421_v61, %v1321_v11  ;;  %v1515_v44 = vadd.f32 %v1458_v51, %v1336_v22  ;;  %v1493_v31 = vadd.f32 %v2363_v48, %v2371_v21 }
 0x295   : > { %v1528_v25 = vadd.f32 %v1491_v36, %v1349_v32  ;;  %v1530_v38 = vadd.f32 %v1496_v4, %v1351_v7  ;;  %v1306_v4 = vmul.f32 %v2331_v57, %v2381_v16  ;;  %v1082_v10 = vmul.f32 %v2184_v6, %v2333_v30 }
 0x296   : > { %v1558_v37 = vpack.c.bf16 %v1526_v56, %v1526_v56  ;;  %v1532_v11 = vpack.c.bf16 %v1500_v28, %v1500_v28  ;;  %v1547_v50 = vpack.c.bf16 %v1515_v44, %v1515_v44  ;;  %v1307_v44 = vmul.f32 %v2305_v14, %v2356_v49 }
 0x297   : > { %v1560_v52 = vpack.c.bf16 %v1528_v25, %v1528_v25  ;;  %v1562_v15 = vpack.c.bf16 %v1530_v38, %v1530_v38  ;;  %v870_v43 = vpop.f32.mrf.mxu2  ;;  %v1338_v56 = vadd.f32 %v1306_v4, %v1082_v10  ;;  %v1083_v24 = vmul.f32 %v2188_v9, %v2358_v0  ;;  %v2586_v10 = vld [vmem:[#allocation10_spill] sm:$0xff] }
 0x298   : > { %1591 = vst.msk [vmem:[%s2386_s15 + $0x68] sm:$0xf] %vm1564_vm10, %v1558_v37  ;;  %v1096_v29 = vmul.f32 %v2248_v63, %v870_v43  ;;  %v1316_v36 = vmul.f32 %v2378_v5, %v870_v43  ;;  %v1318_v21 = vmul.f32 %v1277_v27, %v870_v43  ;;  %v1320_v47 = vmul.f32 %v1287_v39, %v870_v43  ;;  %v2582_v43 = vld [vmem:[#allocation5_spill] sm:$0xff] }
 0x299   : > { %1593 = vst.msk [vmem:[%s2386_s15 + $0x70] sm:$0xf] %vm1564_vm10, %v1560_v52  ;;  %v1422_v42 = vpop.f32.mrf.mxu0  ;;  %v1460_v41 = vpop.f32.mrf.mxu1  ;;  %v1308_v37 = vmul.f32 %v2327_v23, %v2365_v54  ;;  %v1084_v27 = vmul.f32 %v2581_v62, %v2381_v16 }
 0x29a   : > { %1565 = vst.msk [vmem:[%s2386_s15] sm:$0xf] %vm1564_vm10, %v1532_v11  ;;  %v1348_v20 = vadd.f32 %v1316_v36, %v1092_v8  ;;  %v1350_v58 = vadd.f32 %v1318_v21, %v1094_v12  ;;  %v1423_v17 = vadd.f32 %v2363_v48, %v1422_v42  ;;  %v1461_v63 = vadd.f32 %v2363_v48, %v1460_v41 }
 0x29b   : > { %1580 = vst.msk [vmem:[%s2386_s15 + $0x3c] sm:$0xf] %vm1564_vm10, %v1547_v50  ;;  %v1352_v5 = vadd.f32 %v1320_v47, %v1096_v29  ;;  %v1309_v36 = vmul.f32 %v2354_v13, %v2356_v49 }
 0x29c   : > { %1595 = vst.msk [vmem:[%s2386_s15 + $0x78] sm:$0xf] %vm1564_vm10, %v1562_v15  ;;  %v1527_v33 = vadd.f32 %v1488_v55, %v1348_v20  ;;  %v1529_v34 = vadd.f32 %v1493_v31, %v1350_v58  ;;  %v1501_v1 = vadd.f32 %v1423_v17, %v1322_v46  ;;  %v1516_v3 = vadd.f32 %v1461_v63, %v1337_v45  ;;  %v2583_v46 = vld [vmem:[#allocation2_spill] sm:$0xff] }
 0x29d   : > { %v1531_v40 = vadd.f32 %v1498_v53, %v1352_v5  ;;  %v1085_v42 = vmul.f32 %v2583_v46, %v2358_v0  ;;  %v2584_v17 = vld [vmem:[#allocation6_spill] sm:$0xff]  ;;  %v1310_v63 = vmul.f32 %v2339_v26, %v2365_v54 }
 0x29e   : > { %v1559_v35 = vpack.c.bf16 %v1527_v33, %v1527_v33  ;;  %v1561_v61 = vpack.c.bf16 %v1529_v34, %v1529_v34  ;;  %v1533_v22 = vpack.c.bf16 %v1501_v1, %v1501_v1  ;;  %v1548_v51 = vpack.c.bf16 %v1516_v3, %v1516_v3  ;;  %v2585_v33 = vld [vmem:[#allocation3_spill] sm:$0xff] }
 0x29f   : > { %v1563_v55 = vpack.c.bf16 %v1531_v40, %v1531_v40  ;;  %v1341_v20 = vadd.f32 %v1309_v36, %v1085_v42  ;;  %v1086_v34 = vmul.f32 %v2585_v33, %v2381_v16 }
 0x2a0   : > { %1592 = vst.msk [vmem:[%s2386_s15 + $0x6c] sm:$0xf] %vm1564_vm10, %v1559_v35 }
 0x2a1   : > { %1594 = vst.msk [vmem:[%s2386_s15 + $0x74] sm:$0xf] %vm1564_vm10, %v1561_v61  ;;  %v1425_v32 = vpop.f32.mrf.mxu0  ;;  %v1462_v7 = vpop.f32.mrf.mxu1  ;;  %v1342_v4 = vadd.f32 %v1310_v63, %v1086_v34 }
 0x2a2   : > { %1566 = vst.msk [vmem:[%s2386_s15 + $0x4] sm:$0xf] %vm1564_vm10, %v1533_v22  ;;  %v1426_v57 = vadd.f32 %v2363_v48, %v1425_v32  ;;  %v1463_v28 = vadd.f32 %v2363_v48, %v1462_v7 }
 0x2a3   : > { %1581 = vst.msk [vmem:[%s2386_s15 + $0x40] sm:$0xf] %vm1564_vm10, %v1548_v51 }
 0x2a4   : > { %1596 = vst.msk [vmem:[%s2386_s15 + $0x7c] sm:$0xf] %vm1564_vm10, %v1563_v55  ;;  %v1502_v6 = vadd.f32 %v1426_v57, %v2278_v2  ;;  %v1517_v30 = vadd.f32 %v1463_v28, %v1338_v56  ;;  %v1339_v2 = vadd.f32 %v1307_v44, %v1083_v24  ;;  %v2587_v57 = vld [vmem:[#allocation7_spill] sm:$0xff] }
 0x2a5   : > { %v2588_v44 = vld [vmem:[#allocation11_spill] sm:$0xff] }
 0x2a6   : > { %v1534_v19 = vpack.c.bf16 %v1502_v6, %v1502_v6  ;;  %v1549_v18 = vpack.c.bf16 %v1517_v30, %v1517_v30 }
 0x2a8   : > { %1567 = vst.msk [vmem:[%s2386_s15 + $0x8] sm:$0xf] %vm1564_vm10, %v1534_v19 }
 0x2a9   : > { %1582 = vst.msk [vmem:[%s2386_s15 + $0x44] sm:$0xf] %vm1564_vm10, %v1549_v18  ;;  %v1427_v25 = vpop.f32.mrf.mxu0  ;;  %v1465_v38 = vpop.f32.mrf.mxu1 }
 0x2aa   : > { %v1428_v39 = vadd.f32 %v2363_v48, %v1427_v25  ;;  %v1466_v8 = vadd.f32 %v2363_v48, %v1465_v38  ;;  %v2589_v38 = vld [vmem:[#allocation8_spill] sm:$0xff] }
 0x2ac   : > { %v1503_v14 = vadd.f32 %v1428_v39, %v2301_v59  ;;  %v1518_v31 = vadd.f32 %v1466_v8, %v1339_v2  ;;  %v1340_v59 = vadd.f32 %v1308_v37, %v1084_v27  ;;  %v2591_v27 = vld [vmem:[#allocation9_spill] sm:$0xff] }
 0x2ae   : > { %v1535_v11 = vpack.c.bf16 %v1503_v14, %v1503_v14  ;;  %v1550_v9 = vpack.c.bf16 %v1518_v31, %v1518_v31  ;;  %v2590_v31 = vld [vmem:[#allocation12_spill] sm:$0xff] }
 0x2b0   : > { %1568 = vst.msk [vmem:[%s2386_s15 + $0xc] sm:$0xf] %vm1564_vm10, %v1535_v11 }
 0x2b1   : > { %1583 = vst.msk [vmem:[%s2386_s15 + $0x48] sm:$0xf] %vm1564_vm10, %v1550_v9  ;;  %v1430_v12 = vpop.f32.mrf.mxu0  ;;  %v1467_v52 = vpop.f32.mrf.mxu1 }
 0x2b2   : > { %v1431_v50 = vadd.f32 %v2363_v48, %v1430_v12  ;;  %v1468_v15 = vadd.f32 %v2363_v48, %v1467_v52 }
 0x2b4   : > { %v1504_v23 = vadd.f32 %v1431_v50, %v2582_v43  ;;  %v1519_v29 = vadd.f32 %v1468_v15, %v1340_v59  ;;  %v2592_v15 = vld [vmem:[#allocation13_spill] sm:$0xff] }
 0x2b6   : > { %v1536_v21 = vpack.c.bf16 %v1504_v23, %v1504_v23  ;;  %v1551_v47 = vpack.c.bf16 %v1519_v29, %v1519_v29 }
 0x2b8   : > { %1569 = vst.msk [vmem:[%s2386_s15 + $0x10] sm:$0xf] %vm1564_vm10, %v1536_v21 }
 0x2b9   : > { %1584 = vst.msk [vmem:[%s2386_s15 + $0x4c] sm:$0xf] %vm1564_vm10, %v1551_v47  ;;  %v1432_v45 = vpop.f32.mrf.mxu0  ;;  %v1470_v41 = vpop.f32.mrf.mxu1 }
 0x2ba   : > { %v1433_v53 = vadd.f32 %v2363_v48, %v1432_v45  ;;  %v1471_v58 = vadd.f32 %v2363_v48, %v1470_v41 }
 0x2bc   : > { %v1505_v13 = vadd.f32 %v1433_v53, %v2584_v17  ;;  %v1520_v49 = vadd.f32 %v1471_v58, %v1341_v20 }
 0x2be   : > { %v1537_v0 = vpack.c.bf16 %v1505_v13, %v1505_v13  ;;  %v1552_v5 = vpack.c.bf16 %v1520_v49, %v1520_v49 }
 0x2c0   : > { %1570 = vst.msk [vmem:[%s2386_s15 + $0x14] sm:$0xf] %vm1564_vm10, %v1537_v0 }
 0x2c1   : > { %1585 = vst.msk [vmem:[%s2386_s15 + $0x50] sm:$0xf] %vm1564_vm10, %v1552_v5  ;;  %v1435_v1 = vpop.f32.mrf.mxu0  ;;  %v1472_v3 = vpop.f32.mrf.mxu1 }
 0x2c2   : > { %v1436_v40 = vadd.f32 %v2363_v48, %v1435_v1  ;;  %v1473_v35 = vadd.f32 %v2363_v48, %v1472_v3 }
 0x2c4   : > { %v1506_v26 = vadd.f32 %v1436_v40, %v2317_v60  ;;  %v1521_v54 = vadd.f32 %v1473_v35, %v1342_v4 }
 0x2c6   : > { %v1538_v61 = vpack.c.bf16 %v1506_v26, %v1506_v26  ;;  %v1553_v22 = vpack.c.bf16 %v1521_v54, %v1521_v54 }
 0x2c8   : > { %1571 = vst.msk [vmem:[%s2386_s15 + $0x18] sm:$0xf] %vm1564_vm10, %v1538_v61 }
 0x2c9   : > { %1586 = vst.msk [vmem:[%s2386_s15 + $0x54] sm:$0xf] %vm1564_vm10, %v1553_v22  ;;  %v1437_v16 = vpop.f32.mrf.mxu0 }
 0x2ca   : > { %v1438_v51 = vadd.f32 %v2363_v48, %v1437_v16 }
 0x2cc   : > { %v1507_v55 = vadd.f32 %v1438_v51, %v2586_v10 }
 0x2ce   : > { %v1539_v32 = vpack.c.bf16 %v1507_v55, %v1507_v55 }
 0x2d0   : > { %1572 = vst.msk [vmem:[%s2386_s15 + $0x1c] sm:$0xf] %vm1564_vm10, %v1539_v32 }
 0x2d1   : > { %v1440_v7 = vpop.f32.mrf.mxu0 }
 0x2d2   : > { %v1441_v60 = vadd.f32 %v2363_v48, %v1440_v7 }
 0x2d4   : > { %v1508_v56 = vadd.f32 %v1441_v60, %v2587_v57 }
 0x2d6   : > { %v1540_v28 = vpack.c.bf16 %v1508_v56, %v1508_v56 }
 0x2d8   : > { %1573 = vst.msk [vmem:[%s2386_s15 + $0x20] sm:$0xf] %vm1564_vm10, %v1540_v28 }
 0x2d9   : > { %v1442_v6 = vpop.f32.mrf.mxu0 }
 0x2da   : > { %v1443_v30 = vadd.f32 %v2363_v48, %v1442_v6 }
 0x2dc   : > { %v1509_v19 = vadd.f32 %v1443_v30, %v2588_v44 }
 0x2de   : > { %v1541_v18 = vpack.c.bf16 %v1509_v19, %v1509_v19 }
 0x2e0   : > { %1574 = vst.msk [vmem:[%s2386_s15 + $0x24] sm:$0xf] %vm1564_vm10, %v1541_v18 }
 0x2e1   : > { %v1445_v24 = vpop.f32.mrf.mxu0 }
 0x2e2   : > { %v1446_v25 = vadd.f32 %v2363_v48, %v1445_v24 }
 0x2e4   : > { %v1510_v39 = vadd.f32 %v1446_v25, %v2589_v38 }
 0x2e6   : > { %v1542_v2 = vpack.c.bf16 %v1510_v39, %v1510_v39 }
 0x2e8   : > { %1575 = vst.msk [vmem:[%s2386_s15 + $0x28] sm:$0xf] %vm1564_vm10, %v1542_v2 }
 0x2e9   : > { %v1447_v8 = vpop.f32.mrf.mxu0 }
 0x2ea   : > { %v1448_v14 = vadd.f32 %v2363_v48, %v1447_v8 }
 0x2ec   : > { %v1511_v37 = vadd.f32 %v1448_v14, %v2590_v31 }
 0x2ee   : > { %v1543_v11 = vpack.c.bf16 %v1511_v37, %v1511_v37 }
 0x2f0   : > { %1576 = vst.msk [vmem:[%s2386_s15 + $0x2c] sm:$0xf] %vm1564_vm10, %v1543_v11 }
 0x2f1   : > { %v1450_v9 = vpop.f32.mrf.mxu0 }
 0x2f2   : > { %v1451_v62 = vadd.f32 %v2363_v48, %v1450_v9 }
 0x2f4   : > { %v1512_v12 = vadd.f32 %v1451_v62, %v2591_v27 }
 0x2f6   : > { %v1544_v52 = vpack.c.bf16 %v1512_v12, %v1512_v12 }
 0x2f8   : > { %1577 = vst.msk [vmem:[%s2386_s15 + $0x30] sm:$0xf] %vm1564_vm10, %v1544_v52 }
 0x2f9   : > { %v1452_v50 = vpop.f32.mrf.mxu0 }
 0x2fa   : > { %v1453_v59 = vadd.f32 %v2363_v48, %v1452_v50 }
 0x2fc   : > { %v1513_v43 = vadd.f32 %v1453_v59, %v2592_v15 }
 0x2fe   : > { %v1545_v23 = vpack.c.bf16 %v1513_v43, %v1513_v43 }
 0x300   : > { %1578 = vst.msk [vmem:[%s2386_s15 + $0x34] sm:$0xf] %vm1564_vm10, %v1545_v23 }
 0x301 PF: > { %s21_s17 = sadd.s32 1, %s1787_s17  }
 0x302   : > { %p18_p4 = scmp.ge.s32.totalorder %s21_s17, 4  }
 0x304   :  { %20 = sbr.rel (!%p18_p4) target bundleno = 1 (0x1), region = 97 }

</bundles_post_ra>
